<compile_context>
chip_gen: v5e
topology: v5e:2x2
jax: 0.10.0
libtpu: 0.0.40
codegen_flags: <defaults>
</compile_context>

<pallas_src>
import math
import functools

import jax
import jax.numpy as jnp
from jax.experimental import pallas as pl
from jax.experimental.pallas import tpu as pltpu


_FC_CHUNK = 8  # timesteps per interleaved FC matmul


def _round_up(v, m):
    return ((v + m - 1) // m) * m


def lstm_fc_kernel(x_ref, wih_ref, whh_ref, b_ref, wfc_ref, bfc_ref,
                   out_ref, h_ref, c_ref, xg_ref):
    """One grid step = one block of `TT` timesteps (time-major internal layout).

    x_ref   : (TT, Bp, I)   bf16 input block (time-major, batch padded to Bp)
    wih_ref : (I, 4*Hp)     bf16 W_ih^T, per-gate padded to Hp lanes (zeros in padding)
    whh_ref : (Hp, 4*Hp)    bf16 W_hh^T, padded
    b_ref   : (1, 4*Hp)     f32  b_ih + b_hh (padded gate columns zero)
    wfc_ref : (Hp, Op)      bf16 W_fc^T, padded
    bfc_ref : (1, Op)       f32  b_fc, padded
    out_ref : (TT, Bp, Op)  f32  lane-dense padded output block
    h_ref   : (Bp, Hp)      f32  hidden state, persists across grid steps
    c_ref   : (Bp, Hp)      f32  cell state, persists across grid steps
    xg_ref  : (TT, Bp, 4Hp) f32  parked input-projection result (bounds vreg pressure)
    """
    tb = pl.program_id(0)

    @pl.when(tb == 0)
    def _():
        h_ref[...] = jnp.zeros_like(h_ref)   # zero h0/c0, as in the PyTorch module
        c_ref[...] = jnp.zeros_like(c_ref)

    TT, Bp, I = x_ref.shape
    Hp = h_ref.shape[-1]
    Op = out_ref.shape[-1]
    bf16 = jnp.bfloat16

    # ---- Hoisted input projection: one bf16 MXU pass for the whole time block ----
    #   (TT*Bp, I) @ (I, 4*Hp) + bias -> parked in VMEM, reloaded per timestep.
    x_all = x_ref[...].reshape(TT * Bp, I)                       # bf16
    xg = (jnp.dot(x_all, wih_ref[...], preferred_element_type=jnp.float32)
          + b_ref[...])                                          # f32
    xg_ref[...] = xg.reshape(TT, Bp, 4 * Hp)

    whh = whh_ref[...]                                           # (Hp, 4Hp) bf16
    wfc = wfc_ref[...]                                           # (Hp, Op)  bf16
    bfc = bfc_ref[...]                                           # (1, Op)   f32
    h = h_ref[...]
    c = c_ref[...]

    fc_chunk = min(TT, _FC_CHUNK)
    h_chunk = []
    # ---- Sequential recurrence, fully unrolled (TT is a small static constant) ----
    for t in range(TT):
        gates = xg_ref[t] + jnp.dot(h.astype(bf16), whh,
                                    preferred_element_type=jnp.float32)
        # PyTorch gate order i, f, g, o; each slice starts on a 128-lane boundary.
        i_g = jax.nn.sigmoid(gates[:, 0 * Hp:1 * Hp])
        f_g = jax.nn.sigmoid(gates[:, 1 * Hp:2 * Hp])
        g_g = jnp.tanh(gates[:, 2 * Hp:3 * Hp])
        o_g = jax.nn.sigmoid(gates[:, 3 * Hp:4 * Hp])
        c = f_g * c + i_g * g_g
        h = o_g * jnp.tanh(c)
        h_chunk.append(h)                       # stays in vregs — no masked vst

        # ---- Interleaved FC on the finished chunk: one bf16 matmul + one
        #      unmasked, lane-dense slab store; hides under recurrence slack. ----
        if len(h_chunk) == fc_chunk or t == TT - 1:
            n = len(h_chunk)
            t0 = t + 1 - n
            hs = jnp.stack(h_chunk, axis=0).reshape(n * Bp, Hp)
            yc = (jnp.dot(hs.astype(bf16), wfc,
                          preferred_element_type=jnp.float32) + bfc)
            out_ref[pl.ds(t0, n)] = yc.reshape(n, Bp, Op)
            h_chunk = []

    h_ref[...] = h
    c_ref[...] = c


@functools.partial(jax.jit, static_argnames=("t_block",))
def improved_rnn_forward(x, params, t_block=None):
    """x: (B, T, input_size) float32 (batch_first) -> (B, T, output_size) float32."""
    B, T, I = x.shape
    w_ih, w_hh, b_ih, b_hh, w_fc, b_fc = (
        params["w_ih"], params["w_hh"], params["b_ih"], params["b_hh"],
        params["w_fc"], params["b_fc"])
    H = w_hh.shape[1]
    O = w_fc.shape[0]

    Hp = _round_up(H, 128)   # per-gate lane padding -> 128-lane-aligned gate slices
    Op = _round_up(O, 128)   # lane-dense output store
    Bp = _round_up(B, 8)     # full-sublane vreg ops / stores in the recurrence

    if t_block is None:
        t_block = T
    assert T % t_block == 0, "t_block must divide T"

    f32 = jnp.float32
    bf16 = jnp.bfloat16

    # Time-major, batch-padded, bf16 input for the MXU (pad rows are zero).
    x_tm = jnp.zeros((T, Bp, I), bf16).at[:, :B, :].set(
        jnp.transpose(x, (1, 0, 2)).astype(bf16))

    # Pack weights: transpose for row-major matmuls, pad each gate to Hp lanes,
    # then cast the packed slabs to bf16 (accumulation stays f32 in-kernel).
    def pad_gates(w):  # w: (4H, K) -> (K, 4*Hp), zero-padded per gate
        wt = jnp.transpose(w).astype(f32)            # (K, 4H)
        K = wt.shape[0]
        out = jnp.zeros((K, 4 * Hp), f32)
        for g in range(4):
            out = out.at[:, g * Hp:g * Hp + H].set(wt[:, g * H:(g + 1) * H])
        return out

    wih_p = pad_gates(w_ih).astype(bf16)                               # (I, 4Hp)
    whh_p = (jnp.zeros((Hp, 4 * Hp), f32)
             .at[:H, :].set(pad_gates(w_hh))).astype(bf16)             # (Hp, 4Hp)

    b = (b_ih + b_hh).astype(f32)
    b_p = jnp.zeros((1, 4 * Hp), f32)
    for g in range(4):
        b_p = b_p.at[0, g * Hp:g * Hp + H].set(b[g * H:(g + 1) * H])

    wfc_p = (jnp.zeros((Hp, Op), f32)
             .at[:H, :O].set(jnp.transpose(w_fc).astype(f32))).astype(bf16)
    bfc_p = jnp.zeros((1, Op), f32).at[0, :O].set(b_fc.astype(f32))

    out_tm = pl.pallas_call(
        lstm_fc_kernel,
        out_shape=jax.ShapeDtypeStruct((T, Bp, Op), f32),
        grid_spec=pltpu.PrefetchScalarGridSpec(
            num_scalar_prefetch=0,
            grid=(T // t_block,),
            in_specs=[
                pl.BlockSpec((t_block, Bp, I), lambda tb: (tb, 0, 0)),   # x block
                pl.BlockSpec((I, 4 * Hp), lambda tb: (0, 0)),            # W_ih^T
                pl.BlockSpec((Hp, 4 * Hp), lambda tb: (0, 0)),           # W_hh^T
                pl.BlockSpec((1, 4 * Hp), lambda tb: (0, 0)),            # bias
                pl.BlockSpec((Hp, Op), lambda tb: (0, 0)),               # W_fc^T
                pl.BlockSpec((1, Op), lambda tb: (0, 0)),                # b_fc
            ],
            out_specs=pl.BlockSpec((t_block, Bp, Op), lambda tb: (tb, 0, 0)),
            scratch_shapes=[
                pltpu.VMEM((Bp, Hp), f32),                # h state (persists)
                pltpu.VMEM((Bp, Hp), f32),                # c state (persists)
                pltpu.VMEM((t_block, Bp, 4 * Hp), f32),   # parked input projection
            ],
        ),
        compiler_params=pltpu.CompilerParams(
            # Time recurrence is sequential; state scratch must persist on one core.
            dimension_semantics=("arbitrary",),
            vmem_limit_bytes=32 * 1024 * 1024),
    )(x_tm, wih_p, whh_p, b_p, wfc_p, bfc_p)

    # Drop batch/lane padding and return batch-first.
    return jnp.transpose(out_tm[:, :B, :O], (1, 0, 2))


def reference_forward(x, params):
    """Pure-JAX f32 reference of the PyTorch module forward (lax.scan over time)."""
    w_ih, w_hh, b_ih, b_hh, w_fc, b_fc = (
        params["w_ih"], params["w_hh"], params["b_ih"], params["b_hh"],
        params["w_fc"], params["b_fc"])
    B = x.shape[0]
    H = w_hh.shape[1]

    def step(carry, x_t):
        h, c = carry
        gates = x_t @ w_ih.T + h @ w_hh.T + b_ih + b_hh
        i = jax.nn.sigmoid(gates[:, 0:H])
        f = jax.nn.sigmoid(gates[:, H:2 * H])
        g = jnp.tanh(gates[:, 2 * H:3 * H])
        o = jax.nn.sigmoid(gates[:, 3 * H:4 * H])
        c = f * c + i * g
        h = o * jnp.tanh(c)
        return (h, c), h

    h0 = jnp.zeros((B, H), jnp.float32)
    c0 = jnp.zeros((B, H), jnp.float32)
    _, hs = jax.lax.scan(step, (h0, c0), jnp.transpose(x, (1, 0, 2)))
    out = jnp.einsum("tbh,oh->tbo", hs, w_fc) + b_fc
    return jnp.transpose(out, (1, 0, 2))


def init_params(key, input_size, hidden_size, output_size):
    """Deterministic init matching PyTorch param shapes (uniform +/- 1/sqrt(H))."""
    ks = jax.random.split(key, 6)
    bound = 1.0 / math.sqrt(hidden_size)
    u = lambda k, shape: jax.random.uniform(k, shape, jnp.float32, -bound, bound)
    return {
        "w_ih": u(ks[0], (4 * hidden_size, input_size)),
        "w_hh": u(ks[1], (4 * hidden_size, hidden_size)),
        "b_ih": u(ks[2], (4 * hidden_size,)),
        "b_hh": u(ks[3], (4 * hidden_size,)),
        "w_fc": u(ks[4], (output_size, hidden_size)),
        "b_fc": u(ks[5], (output_size,)),
    }


if __name__ == "__main__":
    B, T, INPUT, HIDDEN, OUTPUT = 2, 8, 16, 32, 8

    key = jax.random.PRNGKey(0)
    kx, kp = jax.random.split(key)
    x = jax.random.normal(kx, (B, T, INPUT), jnp.float32)
    params = init_params(kp, INPUT, HIDDEN, OUTPUT)

    out = improved_rnn_forward(x, params)
    out = jax.block_until_ready(out)

    ref = jax.block_until_ready(reference_forward(x, params))
    assert out.shape == (B, T, OUTPUT)
    # bf16 MXU operands with f32 accumulation: loosen tolerance vs the f32 reference.
    assert jnp.allclose(out, ref, atol=3e-2, rtol=3e-2), "mismatch vs reference"

    print("KERNEL_OK")
</pallas_src>

<mosaic_0001>
module attributes {stable_mosaic.version = 11 : i64} {
  func.func @lstm_fc_kernel(%arg0: i32, %arg1: memref<8x8x16xbf16, #tpu.memory_space<vmem>>, %arg2: memref<16x512xbf16, #tpu.memory_space<vmem>>, %arg3: memref<128x512xbf16, #tpu.memory_space<vmem>>, %arg4: memref<1x512xf32, #tpu.memory_space<vmem>>, %arg5: memref<128x128xbf16, #tpu.memory_space<vmem>>, %arg6: memref<1x128xf32, #tpu.memory_space<vmem>>, %arg7: memref<8x8x128xf32, #tpu.memory_space<vmem>>, %arg8: memref<8x128xf32, #tpu.memory_space<vmem>>, %arg9: memref<8x128xf32, #tpu.memory_space<vmem>>, %arg10: memref<8x8x512xf32, #tpu.memory_space<vmem>>) attributes {dimension_semantics = [#tpu.dimension_semantics<arbitrary>], iteration_bounds = array<i64: 1>, scalar_prefetch = 0 : i64, scratch_operands = 3 : i64, tpu.core_type = #tpu.core_type<tc>, window_params = [{transform_indices = @transform_0, window_bounds = array<i64: 8, 8, 16>}, {pipeline_mode = #tpu.pipeline_mode<synchronous>, transform_indices = @transform_1, window_bounds = array<i64: 16, 512>}, {pipeline_mode = #tpu.pipeline_mode<synchronous>, transform_indices = @transform_2, window_bounds = array<i64: 128, 512>}, {pipeline_mode = #tpu.pipeline_mode<synchronous>, transform_indices = @transform_3, window_bounds = array<i64: 1, 512>}, {pipeline_mode = #tpu.pipeline_mode<synchronous>, transform_indices = @transform_4, window_bounds = array<i64: 128, 128>}, {pipeline_mode = #tpu.pipeline_mode<synchronous>, transform_indices = @transform_5, window_bounds = array<i64: 1, 128>}, {transform_indices = @transform_6, window_bounds = array<i64: 8, 8, 128>}]} {
    %c0_i32 = arith.constant 0 : i32
    %0 = arith.cmpi eq, %arg0, %c0_i32 : i32
    %1 = arith.extui %0 : i1 to i32
    %c0_i32_0 = arith.constant 0 : i32
    %2 = arith.cmpi ne, %1, %c0_i32_0 : i32
    scf.if %2 {
      %cst_77 = arith.constant 0.000000e+00 : f32
      %275 = vector.broadcast %cst_77 : f32 to vector<8x128xf32>
      %c0_78 = arith.constant 0 : index
      %c0_79 = arith.constant 0 : index
      %276 = vector.load %arg8[%c0_78, %c0_79] : memref<8x128xf32, #tpu.memory_space<vmem>>, vector<8x128xf32>
      tpu.vector_store %arg8[%c0_78, %c0_79], %275 {strides = array<i32>} : memref<8x128xf32, #tpu.memory_space<vmem>>, vector<8x128xf32>,
      %cst_80 = arith.constant 0.000000e+00 : f32
      %277 = vector.broadcast %cst_80 : f32 to vector<8x128xf32>
      %c0_81 = arith.constant 0 : index
      %c0_82 = arith.constant 0 : index
      %278 = vector.load %arg9[%c0_81, %c0_82] : memref<8x128xf32, #tpu.memory_space<vmem>>, vector<8x128xf32>
      tpu.vector_store %arg9[%c0_81, %c0_82], %277 {strides = array<i32>} : memref<8x128xf32, #tpu.memory_space<vmem>>, vector<8x128xf32>,
    } else {
    }
    %c0 = arith.constant 0 : index
    %c0_1 = arith.constant 0 : index
    %c0_2 = arith.constant 0 : index
    %3 = vector.load %arg1[%c0, %c0_1, %c0_2] : memref<8x8x16xbf16, #tpu.memory_space<vmem>>, vector<8x8x16xbf16>
    %4 = vector.shape_cast %3 : vector<8x8x16xbf16> to vector<64x16xbf16>
    %c0_3 = arith.constant 0 : index
    %c0_4 = arith.constant 0 : index
    %5 = vector.load %arg2[%c0_3, %c0_4] : memref<16x512xbf16, #tpu.memory_space<vmem>>, vector<16x512xbf16>
    %cst = arith.constant dense<0.000000e+00> : vector<64x512xf32>
    %6 = tpu.matmul %4, %5, %cst {dimension_numbers = #tpu.dot_dimension_numbers<[1], [0], [0], [1], [0, 0, 1, 1], [], []>} : vector<64x16xbf16>, vector<16x512xbf16>, vector<64x512xf32> -> vector<64x512xf32>
    %c0_5 = arith.constant 0 : index
    %c0_6 = arith.constant 0 : index
    %7 = vector.load %arg4[%c0_5, %c0_6] : memref<1x512xf32, #tpu.memory_space<vmem>>, vector<1x512xf32>
    %8 = vector.broadcast %7 : vector<1x512xf32> to vector<64x512xf32>
    %9 = arith.addf %6, %8 : vector<64x512xf32>
    %10 = vector.shape_cast %9 : vector<64x512xf32> to vector<8x8x512xf32>
    %c0_7 = arith.constant 0 : index
    %c0_8 = arith.constant 0 : index
    %c0_9 = arith.constant 0 : index
    %11 = vector.load %arg10[%c0_7, %c0_8, %c0_9] : memref<8x8x512xf32, #tpu.memory_space<vmem>>, vector<8x8x512xf32>
    tpu.vector_store %arg10[%c0_7, %c0_8, %c0_9], %10 {strides = array<i32>} : memref<8x8x512xf32, #tpu.memory_space<vmem>>, vector<8x8x512xf32>,
    %c0_10 = arith.constant 0 : index
    %c0_11 = arith.constant 0 : index
    %12 = vector.load %arg3[%c0_10, %c0_11] : memref<128x512xbf16, #tpu.memory_space<vmem>>, vector<128x512xbf16>
    %c0_12 = arith.constant 0 : index
    %c0_13 = arith.constant 0 : index
    %13 = vector.load %arg5[%c0_12, %c0_13] : memref<128x128xbf16, #tpu.memory_space<vmem>>, vector<128x128xbf16>
    %c0_14 = arith.constant 0 : index
    %c0_15 = arith.constant 0 : index
    %14 = vector.load %arg6[%c0_14, %c0_15] : memref<1x128xf32, #tpu.memory_space<vmem>>, vector<1x128xf32>
    %c0_16 = arith.constant 0 : index
    %c0_17 = arith.constant 0 : index
    %15 = vector.load %arg8[%c0_16, %c0_17] : memref<8x128xf32, #tpu.memory_space<vmem>>, vector<8x128xf32>
    %c0_18 = arith.constant 0 : index
    %c0_19 = arith.constant 0 : index
    %16 = vector.load %arg9[%c0_18, %c0_19] : memref<8x128xf32, #tpu.memory_space<vmem>>, vector<8x128xf32>
    %c0_20 = arith.constant 0 : index
    %c0_21 = arith.constant 0 : index
    %c0_22 = arith.constant 0 : index
    %17 = vector.load %arg10[%c0_20, %c0_21, %c0_22] : memref<8x8x512xf32, #tpu.memory_space<vmem>>, vector<1x8x512xf32>
    %18 = vector.shape_cast %17 : vector<1x8x512xf32> to vector<8x512xf32>
    %19 = arith.truncf %15 : vector<8x128xf32> to vector<8x128xbf16>
    %cst_23 = arith.constant dense<0.000000e+00> : vector<8x512xf32>
    %20 = tpu.matmul %19, %12, %cst_23 {dimension_numbers = #tpu.dot_dimension_numbers<[1], [0], [0], [1], [0, 0, 1, 1], [], []>} : vector<8x128xbf16>, vector<128x512xbf16>, vector<8x512xf32> -> vector<8x512xf32>
    %21 = arith.addf %18, %20 : vector<8x512xf32>
    %22 = vector.extract_strided_slice %21 {offsets = [0, 0], sizes = [8, 128], strides = [1, 1]} : vector<8x512xf32> to vector<8x128xf32>
    %23 = arith.negf %22 : vector<8x128xf32>
    %24 = math.exp %23 : vector<8x128xf32>
    %cst_24 = arith.constant 1.000000e+00 : f32
    %25 = vector.broadcast %cst_24 : f32 to vector<8x128xf32>
    %26 = arith.addf %25, %24 : vector<8x128xf32>
    %27 = arith.divf %25, %26 : vector<8x128xf32>
    %28 = vector.extract_strided_slice %21 {offsets = [0, 128], sizes = [8, 128], strides = [1, 1]} : vector<8x512xf32> to vector<8x128xf32>
    %29 = arith.negf %28 : vector<8x128xf32>
    %30 = math.exp %29 : vector<8x128xf32>
    %cst_25 = arith.constant 1.000000e+00 : f32
    %31 = vector.broadcast %cst_25 : f32 to vector<8x128xf32>
    %32 = arith.addf %31, %30 : vector<8x128xf32>
    %33 = arith.divf %31, %32 : vector<8x128xf32>
    %34 = vector.extract_strided_slice %21 {offsets = [0, 256], sizes = [8, 128], strides = [1, 1]} : vector<8x512xf32> to vector<8x128xf32>
    %35 = math.tanh %34 : vector<8x128xf32>
    %36 = vector.extract_strided_slice %21 {offsets = [0, 384], sizes = [8, 128], strides = [1, 1]} : vector<8x512xf32> to vector<8x128xf32>
    %37 = arith.negf %36 : vector<8x128xf32>
    %38 = math.exp %37 : vector<8x128xf32>
    %cst_26 = arith.constant 1.000000e+00 : f32
    %39 = vector.broadcast %cst_26 : f32 to vector<8x128xf32>
    %40 = arith.addf %39, %38 : vector<8x128xf32>
    %41 = arith.divf %39, %40 : vector<8x128xf32>
    %42 = arith.mulf %33, %16 : vector<8x128xf32>
    %43 = arith.mulf %27, %35 : vector<8x128xf32>
    %44 = arith.addf %42, %43 : vector<8x128xf32>
    %45 = math.tanh %44 : vector<8x128xf32>
    %46 = arith.mulf %41, %45 : vector<8x128xf32>
    %c1 = arith.constant 1 : index
    %c0_27 = arith.constant 0 : index
    %c0_28 = arith.constant 0 : index
    %47 = vector.load %arg10[%c1, %c0_27, %c0_28] : memref<8x8x512xf32, #tpu.memory_space<vmem>>, vector<1x8x512xf32>
    %48 = vector.shape_cast %47 : vector<1x8x512xf32> to vector<8x512xf32>
    %49 = arith.truncf %46 : vector<8x128xf32> to vector<8x128xbf16>
    %cst_29 = arith.constant dense<0.000000e+00> : vector<8x512xf32>
    %50 = tpu.matmul %49, %12, %cst_29 {dimension_numbers = #tpu.dot_dimension_numbers<[1], [0], [0], [1], [0, 0, 1, 1], [], []>} : vector<8x128xbf16>, vector<128x512xbf16>, vector<8x512xf32> -> vector<8x512xf32>
    %51 = arith.addf %48, %50 : vector<8x512xf32>
    %52 = vector.extract_strided_slice %51 {offsets = [0, 0], sizes = [8, 128], strides = [1, 1]} : vector<8x512xf32> to vector<8x128xf32>
    %53 = arith.negf %52 : vector<8x128xf32>
    %54 = math.exp %53 : vector<8x128xf32>
    %cst_30 = arith.constant 1.000000e+00 : f32
    %55 = vector.broadcast %cst_30 : f32 to vector<8x128xf32>
    %56 = arith.addf %55, %54 : vector<8x128xf32>
    %57 = arith.divf %55, %56 : vector<8x128xf32>
    %58 = vector.extract_strided_slice %51 {offsets = [0, 128], sizes = [8, 128], strides = [1, 1]} : vector<8x512xf32> to vector<8x128xf32>
    %59 = arith.negf %58 : vector<8x128xf32>
    %60 = math.exp %59 : vector<8x128xf32>
    %cst_31 = arith.constant 1.000000e+00 : f32
    %61 = vector.broadcast %cst_31 : f32 to vector<8x128xf32>
    %62 = arith.addf %61, %60 : vector<8x128xf32>
    %63 = arith.divf %61, %62 : vector<8x128xf32>
    %64 = vector.extract_strided_slice %51 {offsets = [0, 256], sizes = [8, 128], strides = [1, 1]} : vector<8x512xf32> to vector<8x128xf32>
    %65 = math.tanh %64 : vector<8x128xf32>
    %66 = vector.extract_strided_slice %51 {offsets = [0, 384], sizes = [8, 128], strides = [1, 1]} : vector<8x512xf32> to vector<8x128xf32>
    %67 = arith.negf %66 : vector<8x128xf32>
    %68 = math.exp %67 : vector<8x128xf32>
    %cst_32 = arith.constant 1.000000e+00 : f32
    %69 = vector.broadcast %cst_32 : f32 to vector<8x128xf32>
    %70 = arith.addf %69, %68 : vector<8x128xf32>
    %71 = arith.divf %69, %70 : vector<8x128xf32>
    %72 = arith.mulf %63, %44 : vector<8x128xf32>
    %73 = arith.mulf %57, %65 : vector<8x128xf32>
    %74 = arith.addf %72, %73 : vector<8x128xf32>
    %75 = math.tanh %74 : vector<8x128xf32>
    %76 = arith.mulf %71, %75 : vector<8x128xf32>
    %c2 = arith.constant 2 : index
    %c0_33 = arith.constant 0 : index
    %c0_34 = arith.constant 0 : index
    %77 = vector.load %arg10[%c2, %c0_33, %c0_34] : memref<8x8x512xf32, #tpu.memory_space<vmem>>, vector<1x8x512xf32>
    %78 = vector.shape_cast %77 : vector<1x8x512xf32> to vector<8x512xf32>
    %79 = arith.truncf %76 : vector<8x128xf32> to vector<8x128xbf16>
    %cst_35 = arith.constant dense<0.000000e+00> : vector<8x512xf32>
    %80 = tpu.matmul %79, %12, %cst_35 {dimension_numbers = #tpu.dot_dimension_numbers<[1], [0], [0], [1], [0, 0, 1, 1], [], []>} : vector<8x128xbf16>, vector<128x512xbf16>, vector<8x512xf32> -> vector<8x512xf32>
    %81 = arith.addf %78, %80 : vector<8x512xf32>
    %82 = vector.extract_strided_slice %81 {offsets = [0, 0], sizes = [8, 128], strides = [1, 1]} : vector<8x512xf32> to vector<8x128xf32>
    %83 = arith.negf %82 : vector<8x128xf32>
    %84 = math.exp %83 : vector<8x128xf32>
    %cst_36 = arith.constant 1.000000e+00 : f32
    %85 = vector.broadcast %cst_36 : f32 to vector<8x128xf32>
    %86 = arith.addf %85, %84 : vector<8x128xf32>
    %87 = arith.divf %85, %86 : vector<8x128xf32>
    %88 = vector.extract_strided_slice %81 {offsets = [0, 128], sizes = [8, 128], strides = [1, 1]} : vector<8x512xf32> to vector<8x128xf32>
    %89 = arith.negf %88 : vector<8x128xf32>
    %90 = math.exp %89 : vector<8x128xf32>
    %cst_37 = arith.constant 1.000000e+00 : f32
    %91 = vector.broadcast %cst_37 : f32 to vector<8x128xf32>
    %92 = arith.addf %91, %90 : vector<8x128xf32>
    %93 = arith.divf %91, %92 : vector<8x128xf32>
    %94 = vector.extract_strided_slice %81 {offsets = [0, 256], sizes = [8, 128], strides = [1, 1]} : vector<8x512xf32> to vector<8x128xf32>
    %95 = math.tanh %94 : vector<8x128xf32>
    %96 = vector.extract_strided_slice %81 {offsets = [0, 384], sizes = [8, 128], strides = [1, 1]} : vector<8x512xf32> to vector<8x128xf32>
    %97 = arith.negf %96 : vector<8x128xf32>
    %98 = math.exp %97 : vector<8x128xf32>
    %cst_38 = arith.constant 1.000000e+00 : f32
    %99 = vector.broadcast %cst_38 : f32 to vector<8x128xf32>
    %100 = arith.addf %99, %98 : vector<8x128xf32>
    %101 = arith.divf %99, %100 : vector<8x128xf32>
    %102 = arith.mulf %93, %74 : vector<8x128xf32>
    %103 = arith.mulf %87, %95 : vector<8x128xf32>
    %104 = arith.addf %102, %103 : vector<8x128xf32>
    %105 = math.tanh %104 : vector<8x128xf32>
    %106 = arith.mulf %101, %105 : vector<8x128xf32>
    %c3 = arith.constant 3 : index
    %c0_39 = arith.constant 0 : index
    %c0_40 = arith.constant 0 : index
    %107 = vector.load %arg10[%c3, %c0_39, %c0_40] : memref<8x8x512xf32, #tpu.memory_space<vmem>>, vector<1x8x512xf32>
    %108 = vector.shape_cast %107 : vector<1x8x512xf32> to vector<8x512xf32>
    %109 = arith.truncf %106 : vector<8x128xf32> to vector<8x128xbf16>
    %cst_41 = arith.constant dense<0.000000e+00> : vector<8x512xf32>
    %110 = tpu.matmul %109, %12, %cst_41 {dimension_numbers = #tpu.dot_dimension_numbers<[1], [0], [0], [1], [0, 0, 1, 1], [], []>} : vector<8x128xbf16>, vector<128x512xbf16>, vector<8x512xf32> -> vector<8x512xf32>
    %111 = arith.addf %108, %110 : vector<8x512xf32>
    %112 = vector.extract_strided_slice %111 {offsets = [0, 0], sizes = [8, 128], strides = [1, 1]} : vector<8x512xf32> to vector<8x128xf32>
    %113 = arith.negf %112 : vector<8x128xf32>
    %114 = math.exp %113 : vector<8x128xf32>
    %cst_42 = arith.constant 1.000000e+00 : f32
    %115 = vector.broadcast %cst_42 : f32 to vector<8x128xf32>
    %116 = arith.addf %115, %114 : vector<8x128xf32>
    %117 = arith.divf %115, %116 : vector<8x128xf32>
    %118 = vector.extract_strided_slice %111 {offsets = [0, 128], sizes = [8, 128], strides = [1, 1]} : vector<8x512xf32> to vector<8x128xf32>
    %119 = arith.negf %118 : vector<8x128xf32>
    %120 = math.exp %119 : vector<8x128xf32>
    %cst_43 = arith.constant 1.000000e+00 : f32
    %121 = vector.broadcast %cst_43 : f32 to vector<8x128xf32>
    %122 = arith.addf %121, %120 : vector<8x128xf32>
    %123 = arith.divf %121, %122 : vector<8x128xf32>
    %124 = vector.extract_strided_slice %111 {offsets = [0, 256], sizes = [8, 128], strides = [1, 1]} : vector<8x512xf32> to vector<8x128xf32>
    %125 = math.tanh %124 : vector<8x128xf32>
    %126 = vector.extract_strided_slice %111 {offsets = [0, 384], sizes = [8, 128], strides = [1, 1]} : vector<8x512xf32> to vector<8x128xf32>
    %127 = arith.negf %126 : vector<8x128xf32>
    %128 = math.exp %127 : vector<8x128xf32>
    %cst_44 = arith.constant 1.000000e+00 : f32
    %129 = vector.broadcast %cst_44 : f32 to vector<8x128xf32>
    %130 = arith.addf %129, %128 : vector<8x128xf32>
    %131 = arith.divf %129, %130 : vector<8x128xf32>
    %132 = arith.mulf %123, %104 : vector<8x128xf32>
    %133 = arith.mulf %117, %125 : vector<8x128xf32>
    %134 = arith.addf %132, %133 : vector<8x128xf32>
    %135 = math.tanh %134 : vector<8x128xf32>
    %136 = arith.mulf %131, %135 : vector<8x128xf32>
    %c4 = arith.constant 4 : index
    %c0_45 = arith.constant 0 : index
    %c0_46 = arith.constant 0 : index
    %137 = vector.load %arg10[%c4, %c0_45, %c0_46] : memref<8x8x512xf32, #tpu.memory_space<vmem>>, vector<1x8x512xf32>
    %138 = vector.shape_cast %137 : vector<1x8x512xf32> to vector<8x512xf32>
    %139 = arith.truncf %136 : vector<8x128xf32> to vector<8x128xbf16>
    %cst_47 = arith.constant dense<0.000000e+00> : vector<8x512xf32>
    %140 = tpu.matmul %139, %12, %cst_47 {dimension_numbers = #tpu.dot_dimension_numbers<[1], [0], [0], [1], [0, 0, 1, 1], [], []>} : vector<8x128xbf16>, vector<128x512xbf16>, vector<8x512xf32> -> vector<8x512xf32>
    %141 = arith.addf %138, %140 : vector<8x512xf32>
    %142 = vector.extract_strided_slice %141 {offsets = [0, 0], sizes = [8, 128], strides = [1, 1]} : vector<8x512xf32> to vector<8x128xf32>
    %143 = arith.negf %142 : vector<8x128xf32>
    %144 = math.exp %143 : vector<8x128xf32>
    %cst_48 = arith.constant 1.000000e+00 : f32
    %145 = vector.broadcast %cst_48 : f32 to vector<8x128xf32>
    %146 = arith.addf %145, %144 : vector<8x128xf32>
    %147 = arith.divf %145, %146 : vector<8x128xf32>
    %148 = vector.extract_strided_slice %141 {offsets = [0, 128], sizes = [8, 128], strides = [1, 1]} : vector<8x512xf32> to vector<8x128xf32>
    %149 = arith.negf %148 : vector<8x128xf32>
    %150 = math.exp %149 : vector<8x128xf32>
    %cst_49 = arith.constant 1.000000e+00 : f32
    %151 = vector.broadcast %cst_49 : f32 to vector<8x128xf32>
    %152 = arith.addf %151, %150 : vector<8x128xf32>
    %153 = arith.divf %151, %152 : vector<8x128xf32>
    %154 = vector.extract_strided_slice %141 {offsets = [0, 256], sizes = [8, 128], strides = [1, 1]} : vector<8x512xf32> to vector<8x128xf32>
    %155 = math.tanh %154 : vector<8x128xf32>
    %156 = vector.extract_strided_slice %141 {offsets = [0, 384], sizes = [8, 128], strides = [1, 1]} : vector<8x512xf32> to vector<8x128xf32>
    %157 = arith.negf %156 : vector<8x128xf32>
    %158 = math.exp %157 : vector<8x128xf32>
    %cst_50 = arith.constant 1.000000e+00 : f32
    %159 = vector.broadcast %cst_50 : f32 to vector<8x128xf32>
    %160 = arith.addf %159, %158 : vector<8x128xf32>
    %161 = arith.divf %159, %160 : vector<8x128xf32>
    %162 = arith.mulf %153, %134 : vector<8x128xf32>
    %163 = arith.mulf %147, %155 : vector<8x128xf32>
    %164 = arith.addf %162, %163 : vector<8x128xf32>
    %165 = math.tanh %164 : vector<8x128xf32>
    %166 = arith.mulf %161, %165 : vector<8x128xf32>
    %c5 = arith.constant 5 : index
    %c0_51 = arith.constant 0 : index
    %c0_52 = arith.constant 0 : index
    %167 = vector.load %arg10[%c5, %c0_51, %c0_52] : memref<8x8x512xf32, #tpu.memory_space<vmem>>, vector<1x8x512xf32>
    %168 = vector.shape_cast %167 : vector<1x8x512xf32> to vector<8x512xf32>
    %169 = arith.truncf %166 : vector<8x128xf32> to vector<8x128xbf16>
    %cst_53 = arith.constant dense<0.000000e+00> : vector<8x512xf32>
    %170 = tpu.matmul %169, %12, %cst_53 {dimension_numbers = #tpu.dot_dimension_numbers<[1], [0], [0], [1], [0, 0, 1, 1], [], []>} : vector<8x128xbf16>, vector<128x512xbf16>, vector<8x512xf32> -> vector<8x512xf32>
    %171 = arith.addf %168, %170 : vector<8x512xf32>
    %172 = vector.extract_strided_slice %171 {offsets = [0, 0], sizes = [8, 128], strides = [1, 1]} : vector<8x512xf32> to vector<8x128xf32>
    %173 = arith.negf %172 : vector<8x128xf32>
    %174 = math.exp %173 : vector<8x128xf32>
    %cst_54 = arith.constant 1.000000e+00 : f32
    %175 = vector.broadcast %cst_54 : f32 to vector<8x128xf32>
    %176 = arith.addf %175, %174 : vector<8x128xf32>
    %177 = arith.divf %175, %176 : vector<8x128xf32>
    %178 = vector.extract_strided_slice %171 {offsets = [0, 128], sizes = [8, 128], strides = [1, 1]} : vector<8x512xf32> to vector<8x128xf32>
    %179 = arith.negf %178 : vector<8x128xf32>
    %180 = math.exp %179 : vector<8x128xf32>
    %cst_55 = arith.constant 1.000000e+00 : f32
    %181 = vector.broadcast %cst_55 : f32 to vector<8x128xf32>
    %182 = arith.addf %181, %180 : vector<8x128xf32>
    %183 = arith.divf %181, %182 : vector<8x128xf32>
    %184 = vector.extract_strided_slice %171 {offsets = [0, 256], sizes = [8, 128], strides = [1, 1]} : vector<8x512xf32> to vector<8x128xf32>
    %185 = math.tanh %184 : vector<8x128xf32>
    %186 = vector.extract_strided_slice %171 {offsets = [0, 384], sizes = [8, 128], strides = [1, 1]} : vector<8x512xf32> to vector<8x128xf32>
    %187 = arith.negf %186 : vector<8x128xf32>
    %188 = math.exp %187 : vector<8x128xf32>
    %cst_56 = arith.constant 1.000000e+00 : f32
    %189 = vector.broadcast %cst_56 : f32 to vector<8x128xf32>
    %190 = arith.addf %189, %188 : vector<8x128xf32>
    %191 = arith.divf %189, %190 : vector<8x128xf32>
    %192 = arith.mulf %183, %164 : vector<8x128xf32>
    %193 = arith.mulf %177, %185 : vector<8x128xf32>
    %194 = arith.addf %192, %193 : vector<8x128xf32>
    %195 = math.tanh %194 : vector<8x128xf32>
    %196 = arith.mulf %191, %195 : vector<8x128xf32>
    %c6 = arith.constant 6 : index
    %c0_57 = arith.constant 0 : index
    %c0_58 = arith.constant 0 : index
    %197 = vector.load %arg10[%c6, %c0_57, %c0_58] : memref<8x8x512xf32, #tpu.memory_space<vmem>>, vector<1x8x512xf32>
    %198 = vector.shape_cast %197 : vector<1x8x512xf32> to vector<8x512xf32>
    %199 = arith.truncf %196 : vector<8x128xf32> to vector<8x128xbf16>
    %cst_59 = arith.constant dense<0.000000e+00> : vector<8x512xf32>
    %200 = tpu.matmul %199, %12, %cst_59 {dimension_numbers = #tpu.dot_dimension_numbers<[1], [0], [0], [1], [0, 0, 1, 1], [], []>} : vector<8x128xbf16>, vector<128x512xbf16>, vector<8x512xf32> -> vector<8x512xf32>
    %201 = arith.addf %198, %200 : vector<8x512xf32>
    %202 = vector.extract_strided_slice %201 {offsets = [0, 0], sizes = [8, 128], strides = [1, 1]} : vector<8x512xf32> to vector<8x128xf32>
    %203 = arith.negf %202 : vector<8x128xf32>
    %204 = math.exp %203 : vector<8x128xf32>
    %cst_60 = arith.constant 1.000000e+00 : f32
    %205 = vector.broadcast %cst_60 : f32 to vector<8x128xf32>
    %206 = arith.addf %205, %204 : vector<8x128xf32>
    %207 = arith.divf %205, %206 : vector<8x128xf32>
    %208 = vector.extract_strided_slice %201 {offsets = [0, 128], sizes = [8, 128], strides = [1, 1]} : vector<8x512xf32> to vector<8x128xf32>
    %209 = arith.negf %208 : vector<8x128xf32>
    %210 = math.exp %209 : vector<8x128xf32>
    %cst_61 = arith.constant 1.000000e+00 : f32
    %211 = vector.broadcast %cst_61 : f32 to vector<8x128xf32>
    %212 = arith.addf %211, %210 : vector<8x128xf32>
    %213 = arith.divf %211, %212 : vector<8x128xf32>
    %214 = vector.extract_strided_slice %201 {offsets = [0, 256], sizes = [8, 128], strides = [1, 1]} : vector<8x512xf32> to vector<8x128xf32>
    %215 = math.tanh %214 : vector<8x128xf32>
    %216 = vector.extract_strided_slice %201 {offsets = [0, 384], sizes = [8, 128], strides = [1, 1]} : vector<8x512xf32> to vector<8x128xf32>
    %217 = arith.negf %216 : vector<8x128xf32>
    %218 = math.exp %217 : vector<8x128xf32>
    %cst_62 = arith.constant 1.000000e+00 : f32
    %219 = vector.broadcast %cst_62 : f32 to vector<8x128xf32>
    %220 = arith.addf %219, %218 : vector<8x128xf32>
    %221 = arith.divf %219, %220 : vector<8x128xf32>
    %222 = arith.mulf %213, %194 : vector<8x128xf32>
    %223 = arith.mulf %207, %215 : vector<8x128xf32>
    %224 = arith.addf %222, %223 : vector<8x128xf32>
    %225 = math.tanh %224 : vector<8x128xf32>
    %226 = arith.mulf %221, %225 : vector<8x128xf32>
    %c7 = arith.constant 7 : index
    %c0_63 = arith.constant 0 : index
    %c0_64 = arith.constant 0 : index
    %227 = vector.load %arg10[%c7, %c0_63, %c0_64] : memref<8x8x512xf32, #tpu.memory_space<vmem>>, vector<1x8x512xf32>
    %228 = vector.shape_cast %227 : vector<1x8x512xf32> to vector<8x512xf32>
    %229 = arith.truncf %226 : vector<8x128xf32> to vector<8x128xbf16>
    %cst_65 = arith.constant dense<0.000000e+00> : vector<8x512xf32>
    %230 = tpu.matmul %229, %12, %cst_65 {dimension_numbers = #tpu.dot_dimension_numbers<[1], [0], [0], [1], [0, 0, 1, 1], [], []>} : vector<8x128xbf16>, vector<128x512xbf16>, vector<8x512xf32> -> vector<8x512xf32>
    %231 = arith.addf %228, %230 : vector<8x512xf32>
    %232 = vector.extract_strided_slice %231 {offsets = [0, 0], sizes = [8, 128], strides = [1, 1]} : vector<8x512xf32> to vector<8x128xf32>
    %233 = arith.negf %232 : vector<8x128xf32>
    %234 = math.exp %233 : vector<8x128xf32>
    %cst_66 = arith.constant 1.000000e+00 : f32
    %235 = vector.broadcast %cst_66 : f32 to vector<8x128xf32>
    %236 = arith.addf %235, %234 : vector<8x128xf32>
    %237 = arith.divf %235, %236 : vector<8x128xf32>
    %238 = vector.extract_strided_slice %231 {offsets = [0, 128], sizes = [8, 128], strides = [1, 1]} : vector<8x512xf32> to vector<8x128xf32>
    %239 = arith.negf %238 : vector<8x128xf32>
    %240 = math.exp %239 : vector<8x128xf32>
    %cst_67 = arith.constant 1.000000e+00 : f32
    %241 = vector.broadcast %cst_67 : f32 to vector<8x128xf32>
    %242 = arith.addf %241, %240 : vector<8x128xf32>
    %243 = arith.divf %241, %242 : vector<8x128xf32>
    %244 = vector.extract_strided_slice %231 {offsets = [0, 256], sizes = [8, 128], strides = [1, 1]} : vector<8x512xf32> to vector<8x128xf32>
    %245 = math.tanh %244 : vector<8x128xf32>
    %246 = vector.extract_strided_slice %231 {offsets = [0, 384], sizes = [8, 128], strides = [1, 1]} : vector<8x512xf32> to vector<8x128xf32>
    %247 = arith.negf %246 : vector<8x128xf32>
    %248 = math.exp %247 : vector<8x128xf32>
    %cst_68 = arith.constant 1.000000e+00 : f32
    %249 = vector.broadcast %cst_68 : f32 to vector<8x128xf32>
    %250 = arith.addf %249, %248 : vector<8x128xf32>
    %251 = arith.divf %249, %250 : vector<8x128xf32>
    %252 = arith.mulf %243, %224 : vector<8x128xf32>
    %253 = arith.mulf %237, %245 : vector<8x128xf32>
    %254 = arith.addf %252, %253 : vector<8x128xf32>
    %255 = math.tanh %254 : vector<8x128xf32>
    %256 = arith.mulf %251, %255 : vector<8x128xf32>
    %257 = vector.shape_cast %46 : vector<8x128xf32> to vector<1x8x128xf32>
    %258 = vector.shape_cast %76 : vector<8x128xf32> to vector<1x8x128xf32>
    %259 = vector.shape_cast %106 : vector<8x128xf32> to vector<1x8x128xf32>
    %260 = vector.shape_cast %136 : vector<8x128xf32> to vector<1x8x128xf32>
    %261 = vector.shape_cast %166 : vector<8x128xf32> to vector<1x8x128xf32>
    %262 = vector.shape_cast %196 : vector<8x128xf32> to vector<1x8x128xf32>
    %263 = vector.shape_cast %226 : vector<8x128xf32> to vector<1x8x128xf32>
    %264 = vector.shape_cast %256 : vector<8x128xf32> to vector<1x8x128xf32>
    %265 = tpu.concatenate %257, %258, %259, %260, %261, %262, %263, %264 in 0 : vector<1x8x128xf32>, vector<1x8x128xf32>, vector<1x8x128xf32>, vector<1x8x128xf32>, vector<1x8x128xf32>, vector<1x8x128xf32>, vector<1x8x128xf32>, vector<1x8x128xf32> -> vector<8x8x128xf32>
    %266 = vector.shape_cast %265 : vector<8x8x128xf32> to vector<64x128xf32>
    %267 = arith.truncf %266 : vector<64x128xf32> to vector<64x128xbf16>
    %cst_69 = arith.constant dense<0.000000e+00> : vector<64x128xf32>
    %268 = tpu.matmul %267, %13, %cst_69 {dimension_numbers = #tpu.dot_dimension_numbers<[1], [0], [0], [1], [0, 0, 1, 1], [], []>} : vector<64x128xbf16>, vector<128x128xbf16>, vector<64x128xf32> -> vector<64x128xf32>
    %269 = vector.broadcast %14 : vector<1x128xf32> to vector<64x128xf32>
    %270 = arith.addf %268, %269 : vector<64x128xf32>
    %271 = vector.shape_cast %270 : vector<64x128xf32> to vector<8x8x128xf32>
    %c0_70 = arith.constant 0 : index
    %c0_71 = arith.constant 0 : index
    %c0_72 = arith.constant 0 : index
    %272 = vector.load %arg7[%c0_70, %c0_71, %c0_72] : memref<8x8x128xf32, #tpu.memory_space<vmem>>, vector<8x8x128xf32>
    tpu.vector_store %arg7[%c0_70, %c0_71, %c0_72], %271 {strides = array<i32>} : memref<8x8x128xf32, #tpu.memory_space<vmem>>, vector<8x8x128xf32>,
    %c0_73 = arith.constant 0 : index
    %c0_74 = arith.constant 0 : index
    %273 = vector.load %arg8[%c0_73, %c0_74] : memref<8x128xf32, #tpu.memory_space<vmem>>, vector<8x128xf32>
    tpu.vector_store %arg8[%c0_73, %c0_74], %256 {strides = array<i32>} : memref<8x128xf32, #tpu.memory_space<vmem>>, vector<8x128xf32>,
    %c0_75 = arith.constant 0 : index
    %c0_76 = arith.constant 0 : index
    %274 = vector.load %arg9[%c0_75, %c0_76] : memref<8x128xf32, #tpu.memory_space<vmem>>, vector<8x128xf32>
    tpu.vector_store %arg9[%c0_75, %c0_76], %254 {strides = array<i32>} : memref<8x128xf32, #tpu.memory_space<vmem>>, vector<8x128xf32>,
    return
  }
  func.func @transform_0(%arg0: i32) -> (i32, i32, i32) {
    %c0_i32 = arith.constant 0 : i32
    %c0_i32_0 = arith.constant 0 : i32
    %c0_i32_1 = arith.constant 0 : i32
    return %arg0, %c0_i32, %c0_i32_0 : i32, i32, i32
  }
  func.func @transform_1(%arg0: i32) -> (i32, i32) {
    %c0_i32 = arith.constant 0 : i32
    %c0_i32_0 = arith.constant 0 : i32
    %c0_i32_1 = arith.constant 0 : i32
    return %c0_i32, %c0_i32_0 : i32, i32
  }
  func.func @transform_2(%arg0: i32) -> (i32, i32) {
    %c0_i32 = arith.constant 0 : i32
    %c0_i32_0 = arith.constant 0 : i32
    %c0_i32_1 = arith.constant 0 : i32
    return %c0_i32, %c0_i32_0 : i32, i32
  }
  func.func @transform_3(%arg0: i32) -> (i32, i32) {
    %c0_i32 = arith.constant 0 : i32
    %c0_i32_0 = arith.constant 0 : i32
    %c0_i32_1 = arith.constant 0 : i32
    return %c0_i32, %c0_i32_0 : i32, i32
  }
  func.func @transform_4(%arg0: i32) -> (i32, i32) {
    %c0_i32 = arith.constant 0 : i32
    %c0_i32_0 = arith.constant 0 : i32
    %c0_i32_1 = arith.constant 0 : i32
    return %c0_i32, %c0_i32_0 : i32, i32
  }
  func.func @transform_5(%arg0: i32) -> (i32, i32) {
    %c0_i32 = arith.constant 0 : i32
    %c0_i32_0 = arith.constant 0 : i32
    %c0_i32_1 = arith.constant 0 : i32
    return %c0_i32, %c0_i32_0 : i32, i32
  }
  func.func @transform_6(%arg0: i32) -> (i32, i32, i32) {
    %c0_i32 = arith.constant 0 : i32
    %c0_i32_0 = arith.constant 0 : i32
    %c0_i32_1 = arith.constant 0 : i32
    return %arg0, %c0_i32, %c0_i32_0 : i32, i32, i32
  }
}

</mosaic_0001>

<bundles_post_ra>
// kernel: improved_rnn_forward.1
= control target key start
LH: loop header
LB: loop body
LE: loop exit
PB: predicated region body
PF: predicated region fallthrough
CT: control target
= control target key end

     0   :  { %vm92_vm0 = vcmask 130048   ;;  %s2822_s1 = inlined_call_operand.vmem [shape: bf16[16,512], index: 1, kind: input, shape index: {}]   ;;  %s2823_s0 = inlined_call_operand.vmem [shape: bf16[8,8,16], index: 0, kind: input, shape index: {}]   ;;  %s2824_s2 = inlined_call_operand.vmem [shape: bf16[128,512], index: 2, kind: input, shape index: {}]   ;;  %s2825_s3 = inlined_call_operand.vmem [shape: f32[1,512], index: 3, kind: input, shape index: {}]   ;;  %s2826_s4 = inlined_call_operand.vmem [shape: bf16[128,128], index: 4, kind: input, shape index: {}]   ;;  %s2827_s5 = inlined_call_operand.vmem [shape: f32[1,128], index: 5, kind: input, shape index: {}]   ;;  %s2828_s6 = inlined_call_operand.vmem [shape: f32[8,8,128], index: 6, kind: output, shape index: {}]  }
   0x1   :  { %v1579_v0 = vld [vmem:[%s2822_s1] sm:$0xf]  ;;  %v1799_v1 = vld [vmem:[%s2822_s1 + $0xc] sm:$0xf0]  ;;  %v1587_v2 = vld [vmem:[%s2822_s1 + $0x8] sm:$0xf] }
   0x2   :  { %v1580_v3 = vor.u32 %v1799_v1, %v1579_v0  ;;  %v1800_v4 = vld [vmem:[%s2822_s1 + $0x14] sm:$0xf0]  ;;  %v2024_v5 = vld [vmem:[%s2823_s0 + $0x10] sm:$0xff]  ;;  %v1797_v8 = vld [vmem:[%s2822_s1 + $0x4] sm:$0xf] }
   0x3   :  { %v2029_v6 = vld [vmem:[%s2823_s0 + $0x18] sm:$0xff]  ;;  %v1588_v7 = vor.u32 %v1800_v4, %v1587_v2  ;;  %v1581_v9 = vld [vmem:[%s2822_s1 + $0x10] sm:$0xf0]  ;;  %v2040_v10 = vld [vmem:[%s2823_s0] sm:$0xff] }
   0x4   :  { %1841 = vmatpush.bf16.msra.mxu1 %v1580_v3  ;;  %1842 = vmatpush.bf16.msra.mxu3 %v1580_v3  ;;  %v1584_v11 = vor.u32 %v1797_v8, %v1581_v9  ;;  %v1798_v12 = vld [vmem:[%s2822_s1 + $0xc] sm:$0xf]  ;;  %v1589_v13 = vld [vmem:[%s2822_s1 + $0x18] sm:$0xf0]  ;;  %v1723_v14 = vld [vmem:[%s2824_s2 + $0xe0] sm:$0xf] }
   0x5   :  { %170 = vmatpush.bf16.msra.mxu2 %v1588_v7  ;;  %v1592_v15 = vor.u32 %v1798_v12, %v1589_v13  ;;  %v1831_v16 = vld [vmem:[%s2824_s2 + $0xec] sm:$0xf0]  ;;  %v1829_v17 = vld [vmem:[%s2824_s2 + $0xe4] sm:$0xf]  ;;  %112 = vmatpush.bf16.msra.mxu0 %v1580_v3  ;;  %v1725_v19 = vld [vmem:[%s2824_s2 + $0xf0] sm:$0xf0] }
   0x6   :  { %v2057_v18 = vor.u32 %v1831_v16, %v1723_v14  ;;  %v1707_v20 = vld [vmem:[%s2824_s2 + $0xc0] sm:$0xf]  ;;  %v1827_v21 = vld [vmem:[%s2824_s2 + $0xcc] sm:$0xf0]  ;;  %v2072_v22 = vor.u32 %v1829_v17, %v1725_v19  ;;  %v1830_v23 = vld [vmem:[%s2824_s2 + $0xec] sm:$0xf] }
   0x7   :  { %1595 = vmatmul.msk.bf16.vlgmr.msra.gmra.mxu1 %vm92_vm0, %v2024_v5  ;;  %1596 = vmatmul.msk.bf16.vlgmr.msra.gmra.mxu3 %vm92_vm0, %v2029_v6  ;;  %v1733_v24 = vld [vmem:[%s2824_s2 + $0xf8] sm:$0xf0]  ;;  %v1825_v25 = vld [vmem:[%s2824_s2 + $0xc4] sm:$0xf]  ;;  %v1709_v27 = vld [vmem:[%s2824_s2 + $0xd0] sm:$0xf0]  ;;  %v2092_v28 = vor.u32 %v1827_v21, %v1707_v20 }
   0x8   :  { %141 = vmatpush.bf16.msrb.mxu1 %v1584_v11  ;;  %1601 = vmatmul.msk.bf16.vlgmr.msra.gmra.mxu2 %vm92_vm0, %v2040_v10  ;;  %v2085_v26 = vor.u32 %v1830_v23, %v1733_v24  ;;  %v2094_v29 = vor.u32 %v1825_v25, %v1709_v27  ;;  %v1691_v30 = vld [vmem:[%s2824_s2 + $0xa0] sm:$0xf]  ;;  %v1826_v31 = vld [vmem:[%s2824_s2 + $0xcc] sm:$0xf]  ;;  %v1717_v32 = vld [vmem:[%s2824_s2 + $0xd8] sm:$0xf0] }
   0x9   :  { %199 = vmatpush.bf16.msrb.mxu3 %v1592_v15  ;;  %469 = vmatpush.bf16.msrb.mxu2 %v2057_v18  ;;  %v1823_v33 = vld [vmem:[%s2824_s2 + $0xac] sm:$0xf0]  ;;  %v2109_v34 = vor.u32 %v1826_v31, %v1717_v32  ;;  %v1821_v35 = vld [vmem:[%s2824_s2 + $0xa4] sm:$0xf]  ;;  %v1693_v36 = vld [vmem:[%s2824_s2 + $0xb0] sm:$0xf0] }
   0xa   :  { %1593 = vmatmul.msk.bf16.vlgmr.msra.gmra.mxu0 %vm92_vm0, %v2040_v10  ;;  %v1822_v37 = vld [vmem:[%s2824_s2 + $0xac] sm:$0xf]  ;;  %v1701_v38 = vld [vmem:[%s2824_s2 + $0xb8] sm:$0xf0]  ;;  %v2128_v39 = vor.u32 %v1823_v33, %v1691_v30  ;;  %v1675_v40 = vld [vmem:[%s2824_s2 + $0x80] sm:$0xf]  ;;  %v2133_v41 = vor.u32 %v1821_v35, %v1693_v36 }
   0xb   :  { %594 = vmatpush.bf16.msrb.mxu0 %v2057_v18  ;;  %v1819_v42 = vld [vmem:[%s2824_s2 + $0x8c] sm:$0xf0]  ;;  %v2139_v43 = vor.u32 %v1822_v37, %v1701_v38  ;;  %v1817_v44 = vld [vmem:[%s2824_s2 + $0x84] sm:$0xf]  ;;  %v1677_v45 = vld [vmem:[%s2824_s2 + $0x90] sm:$0xf0] }
   0xc   :  { %482 = vmatpush.bf16.msra.mxu1 %v2072_v22  ;;  %v1818_v46 = vld [vmem:[%s2824_s2 + $0x8c] sm:$0xf]  ;;  %v1685_v47 = vld [vmem:[%s2824_s2 + $0x98] sm:$0xf0]  ;;  %v2155_v48 = vor.u32 %v1819_v42, %v1675_v40  ;;  %v2158_v49 = vor.u32 %v1817_v44, %v1677_v45  ;;  %v1659_v50 = vld [vmem:[%s2824_s2 + $0x60] sm:$0xf] }
   0xd   :  { %508 = vmatpush.bf16.msra.mxu3 %v2085_v26  ;;  %470 = vmatpush.bf16.msrb.mxu2 %v2092_v28  ;;  %v1815_v51 = vld [vmem:[%s2824_s2 + $0x6c] sm:$0xf0]  ;;  %v2167_v52 = vor.u32 %v1818_v46, %v1685_v47  ;;  %v1794_v53 = vld [vmem:[%s2823_s0 + $0x8] sm:$0xff]  ;;  %v1643_v55 = vld [vmem:[%s2824_s2 + $0x40] sm:$0xf] }
   0xe   :  { %v2174_v54 = vor.u32 %v1815_v51, %v1659_v50  ;;  %v1811_v56 = vld [vmem:[%s2824_s2 + $0x4c] sm:$0xf0]  ;;  %v1813_v57 = vld [vmem:[%s2824_s2 + $0x64] sm:$0xf]  ;;  %v1661_v58 = vld [vmem:[%s2824_s2 + $0x70] sm:$0xf0] }
   0xf   :  { %595 = vmatpush.bf16.msrb.mxu0 %v2092_v28  ;;  %v2197_v59 = vor.u32 %v1811_v56, %v1643_v55  ;;  %v1627_v60 = vld [vmem:[%s2824_s2 + $0x20] sm:$0xf]  ;;  %v2202_v61 = vor.u32 %v1813_v57, %v1661_v58  ;;  %v1814_v62 = vld [vmem:[%s2824_s2 + $0x6c] sm:$0xf]  ;;  %v1669_v63 = vld [vmem:[%s2824_s2 + $0x78] sm:$0xf0] }
  0x10   :  { %483 = vmatpush.bf16.msra.mxu1 %v2094_v29  ;;  %v1807_v0 = vld [vmem:[%s2824_s2 + $0x2c] sm:$0xf0]  ;;  %v2213_v1 = vor.u32 %v1814_v62, %v1669_v63  ;;  %v1809_v2 = vld [vmem:[%s2824_s2 + $0x44] sm:$0xf]  ;;  %v1645_v3 = vld [vmem:[%s2824_s2 + $0x50] sm:$0xf0] }
  0x11   :  { %509 = vmatpush.bf16.msra.mxu3 %v2109_v34  ;;  %471 = vmatpush.bf16.msrb.mxu2 %v2128_v39  ;;  %v2223_v4 = vor.u32 %v1809_v2, %v1645_v3  ;;  %v1810_v7 = vld [vmem:[%s2824_s2 + $0x4c] sm:$0xf]  ;;  %v1653_v8 = vld [vmem:[%s2824_s2 + $0x58] sm:$0xf0]  ;;  %v2234_v9 = vor.u32 %v1807_v0, %v1627_v60  ;;  %v1611_v11 = vld [vmem:[%s2824_s2] sm:$0xf] }
  0x12   :  { %v1803_v12 = vld [vmem:[%s2824_s2 + $0xc] sm:$0xf0]  ;;  %v1731_v13 = vld [vmem:[%s2824_s2 + $0xe8] sm:$0xf]  ;;  %v1832_v14 = vld [vmem:[%s2824_s2 + $0xf4] sm:$0xf0] }
  0x13   :  { %596 = vmatpush.bf16.msrb.mxu0 %v2128_v39  ;;  %v2254_v15 = vor.u32 %v1803_v12, %v1611_v11  ;;  %v2256_v16 = vor.u32 %v1832_v14, %v1731_v13  ;;  %v1715_v17 = vld [vmem:[%s2824_s2 + $0xc8] sm:$0xf]  ;;  %v1828_v19 = vld [vmem:[%s2824_s2 + $0xd4] sm:$0xf0]  ;;  %v1805_v24 = vld [vmem:[%s2824_s2 + $0x24] sm:$0xf] }
  0x14   :  { %484 = vmatpush.bf16.msra.mxu1 %v2133_v41  ;;  %v2267_v20 = vor.u32 %v1828_v19, %v1715_v17  ;;  %v1699_v21 = vld [vmem:[%s2824_s2 + $0xa8] sm:$0xf]  ;;  %v1824_v23 = vld [vmem:[%s2824_s2 + $0xb4] sm:$0xf0]  ;;  %v1629_v25 = vld [vmem:[%s2824_s2 + $0x30] sm:$0xf0] }
  0x15   :  { %510 = vmatpush.bf16.msra.mxu3 %v2139_v43  ;;  %472 = vmatpush.bf16.msrb.mxu2 %v2155_v48  ;;  %v2286_v27 = vor.u32 %v1805_v24, %v1629_v25  ;;  %v1806_v30 = vld [vmem:[%s2824_s2 + $0x2c] sm:$0xf]  ;;  %v1637_v31 = vld [vmem:[%s2824_s2 + $0x38] sm:$0xf0]  ;;  %v2296_v32 = vor.u32 %v1824_v23, %v1699_v21  ;;  %v1801_v35 = vld [vmem:[%s2824_s2 + $0x4] sm:$0xf] }
  0x16   :  { %v2298_v33 = vor.u32 %v1806_v30, %v1637_v31  ;;  %v1613_v36 = vld [vmem:[%s2824_s2 + $0x10] sm:$0xf0]  ;;  %v1683_v37 = vld [vmem:[%s2824_s2 + $0x88] sm:$0xf]  ;;  %v1820_v38 = vld [vmem:[%s2824_s2 + $0x94] sm:$0xf0] }
  0x17   :  { %1597 = vmatmul.msk.bf16.vlgmr.msrb.gmra.mxu1 %vm92_vm0, %v2040_v10  ;;  %1605 = vmatmul.msk.bf16.vlgmr.msrb.gmra.mxu3 %vm92_vm0, %v2040_v10  ;;  %v2236_v10 = vor.u32 %v1810_v7, %v1653_v8  ;;  %v2313_v40 = vor.u32 %v1801_v35, %v1613_v36  ;;  %v1802_v42 = vld [vmem:[%s2824_s2 + $0xc] sm:$0xf]  ;;  %v1621_v44 = vld [vmem:[%s2824_s2 + $0x18] sm:$0xf0]  ;;  %v2326_v46 = vor.u32 %v1820_v38, %v1683_v37  ;;  %v1667_v47 = vld [vmem:[%s2824_s2 + $0x68] sm:$0xf] }
  0x18   :  { %485 = vmatpush.bf16.msra.mxu1 %v2158_v49  ;;  %1602 = vmatmul.msk.bf16.gmra.mxu2 %vm92_vm0, %v1794_v53  ;;  %v2322_v45 = vor.u32 %v1802_v42, %v1621_v44  ;;  %v1816_v50 = vld [vmem:[%s2824_s2 + $0x74] sm:$0xf0]  ;;  %v1635_v57 = vld [vmem:[%s2824_s2 + $0x28] sm:$0xf]  ;;  %v1973_v0 = vmov 0.0|0.0  }
  0x19   :  { %511 = vmatpush.bf16.msra.mxu3 %v2167_v52  ;;  %597 = vmatpush.bf16.msrb.mxu0 %v2155_v48  ;;  %v2340_v51 = vor.u32 %v1816_v50, %v1667_v47  ;;  %v1812_v55 = vld [vmem:[%s2824_s2 + $0x54] sm:$0xf0]  ;;  %v1619_v60 = vld [vmem:[%s2824_s2 + $0x8] sm:$0xf]  ;;  %v42_v13 = vld [vmem:[%s2825_s3] sm:$0xf] }
  0x1a   :  { %473 = vmatpush.bf16.msrb.mxu2 %v2174_v54  ;;  %1594 = vmatmul.msk.bf16.gmra.mxu0 %vm92_vm0, %v1794_v53  ;;  %v1808_v58 = vld [vmem:[%s2824_s2 + $0x34] sm:$0xf0]  ;;  %v2446_v14 = vperm.slane %v42_v13, 2  ;;  %v45_v19 = vperm.slane %v42_v13, 1  ;;  %v47_v30 = vperm.slane %v42_v13, 3 }
  0x1b   :  { %v1804_v62 = vld [vmem:[%s2824_s2 + $0x14] sm:$0xf0] }
  0x1c   :  { %486 = vmatpush.bf16.msra.mxu1 %v2202_v61  ;;  %v2382_v63 = vor.u32 %v1804_v62, %v1619_v60 }
  0x1d   :  { %512 = vmatpush.bf16.msra.mxu3 %v2213_v1  ;;  %598 = vmatpush.bf16.msrb.mxu0 %v2174_v54 }
  0x1e   :  { %474 = vmatpush.bf16.msrb.mxu2 %v2197_v59 }
  0x20   :  { %487 = vmatpush.bf16.msra.mxu1 %v2223_v4 }
  0x21   :  { %513 = vmatpush.bf16.msra.mxu3 %v2236_v10  ;;  %599 = vmatpush.bf16.msrb.mxu0 %v2197_v59 }
  0x22   :  { %475 = vmatpush.bf16.msrb.mxu2 %v2234_v9 }
  0x24   :  { %488 = vmatpush.bf16.msra.mxu1 %v2286_v27 }
  0x25   :  { %600 = vmatpush.bf16.msrb.mxu0 %v2234_v9  ;;  %514 = vmatpush.bf16.msra.mxu3 %v2298_v33 }
  0x26   :  { %476 = vmatpush.bf16.msrb.mxu2 %v2254_v15 }
  0x27   :  { %1598 = vmatmul.msk.bf16.gmra.mxu1 %vm92_vm0, %v1794_v53  ;;  %1606 = vmatmul.msk.bf16.gmra.mxu3 %vm92_vm0, %v1794_v53  ;;  %v1651_v53 = vld [vmem:[%s2824_s2 + $0x48] sm:$0xf] }
  0x28   :  { %1603 = vmatmul.msk.bf16.gmra.mxu2 %vm92_vm0, %v2024_v5  ;;  %489 = vmatpush.bf16.msra.mxu1 %v2313_v40  ;;  %v2352_v56 = vor.u32 %v1812_v55, %v1651_v53 }
  0x29   :  { %601 = vmatpush.bf16.msrb.mxu0 %v2254_v15  ;;  %515 = vmatpush.bf16.msra.mxu3 %v2322_v45 }
  0x2a   :  { %495 = vmatpush.bf16.msra.mxu2 %v2256_v16 }
  0x2c   :  { %607 = vmatpush.bf16.msrb.mxu1 %v2072_v22 }
  0x2d   :  { %719 = vmatpush.bf16.msra.mxu0 %v2057_v18  ;;  %633 = vmatpush.bf16.msrb.mxu3 %v2085_v26 }
  0x2e   :  { %496 = vmatpush.bf16.msra.mxu2 %v2267_v20 }
  0x30   :  { %608 = vmatpush.bf16.msrb.mxu1 %v2094_v29 }
  0x31   :  { %720 = vmatpush.bf16.msra.mxu0 %v2092_v28  ;;  %634 = vmatpush.bf16.msrb.mxu3 %v2109_v34 }
  0x32   :  { %497 = vmatpush.bf16.msra.mxu2 %v2296_v32 }
  0x34   :  { %609 = vmatpush.bf16.msrb.mxu1 %v2133_v41 }
  0x35   :  { %721 = vmatpush.bf16.msra.mxu0 %v2128_v39  ;;  %635 = vmatpush.bf16.msrb.mxu3 %v2139_v43 }
  0x36   :  { %498 = vmatpush.bf16.msra.mxu2 %v2326_v46 }
  0x37   :  { %1599 = vmatmul.msk.bf16.gmra.mxu1 %vm92_vm0, %v2024_v5  ;;  %1607 = vmatmul.msk.bf16.gmra.mxu3 %vm92_vm0, %v2024_v5  ;;  %v2370_v5 = vor.u32 %v1808_v58, %v1635_v57 }
  0x38   :  { %1604 = vmatmul.msk.bf16.gmra.mxu2 %vm92_vm0, %v2029_v6  ;;  %610 = vmatpush.bf16.msrb.mxu1 %v2158_v49 }
  0x39   :  { %722 = vmatpush.bf16.msra.mxu0 %v2155_v48  ;;  %636 = vmatpush.bf16.msrb.mxu3 %v2167_v52 }
  0x3a   :  { %499 = vmatpush.bf16.msra.mxu2 %v2340_v51 }
  0x3c   :  { %611 = vmatpush.bf16.msrb.mxu1 %v2202_v61 }
  0x3d   :  { %723 = vmatpush.bf16.msra.mxu0 %v2174_v54  ;;  %637 = vmatpush.bf16.msrb.mxu3 %v2213_v1 }
  0x3e   :  { %500 = vmatpush.bf16.msra.mxu2 %v2352_v56 }
  0x40   :  { %612 = vmatpush.bf16.msrb.mxu1 %v2223_v4 }
  0x41   :  { %724 = vmatpush.bf16.msra.mxu0 %v2197_v59  ;;  %638 = vmatpush.bf16.msrb.mxu3 %v2236_v10 }
  0x42   :  { %501 = vmatpush.bf16.msra.mxu2 %v2370_v5 }
  0x44   :  { %613 = vmatpush.bf16.msrb.mxu1 %v2286_v27 }
  0x45   :  { %725 = vmatpush.bf16.msra.mxu0 %v2234_v9  ;;  %639 = vmatpush.bf16.msrb.mxu3 %v2298_v33 }
  0x46   :  { %502 = vmatpush.bf16.msra.mxu2 %v2382_v63 }
  0x47   :  { %1600 = vmatmul.msk.bf16.gmra.mxu1 %vm92_vm0, %v2029_v6  ;;  %1608 = vmatmul.msk.bf16.gmra.mxu3 %vm92_vm0, %v2029_v6 }
  0x48   :  { %477 = vmatmul.bf16.vlgmr.msrb.gmra.mxu2 %v1973_v0  ;;  %614 = vmatpush.bf16.msrb.mxu1 %v2313_v40 }
  0x49   :  { %726 = vmatpush.bf16.msra.mxu0 %v2254_v15  ;;  %640 = vmatpush.bf16.msrb.mxu3 %v2322_v45 }
  0x4a   :  { %620 = vmatpush.bf16.msrb.mxu2 %v2256_v16 }
  0x4e   :  { %621 = vmatpush.bf16.msrb.mxu2 %v2267_v20 }
  0x52   :  { %622 = vmatpush.bf16.msrb.mxu2 %v2296_v32 }
  0x56   :  { %623 = vmatpush.bf16.msrb.mxu2 %v2326_v46 }
  0x57   :  { %490 = vmatmul.bf16.vlgmr.msra.gmra.mxu1 %v1973_v0  ;;  %516 = vmatmul.bf16.vlgmr.msra.gmra.mxu3 %v1973_v0 }
  0x58   :  { %503 = vmatmul.bf16.vlgmr.msra.gmra.mxu2 %v1973_v0  ;;  %732 = vmatpush.bf16.msra.mxu1 %v2072_v22 }
  0x59   :  { %758 = vmatpush.bf16.msra.mxu3 %v2085_v26 }
  0x5a   :  { %624 = vmatpush.bf16.msrb.mxu2 %v2340_v51 }
  0x5c   :  { %733 = vmatpush.bf16.msra.mxu1 %v2094_v29 }
  0x5d   :  { %759 = vmatpush.bf16.msra.mxu3 %v2109_v34 }
  0x5e   :  { %625 = vmatpush.bf16.msrb.mxu2 %v2352_v56 }
  0x60   :  { %734 = vmatpush.bf16.msra.mxu1 %v2133_v41 }
  0x61   :  { %760 = vmatpush.bf16.msra.mxu3 %v2139_v43 }
  0x62   :  { %626 = vmatpush.bf16.msrb.mxu2 %v2370_v5 }
  0x64   :  { %735 = vmatpush.bf16.msra.mxu1 %v2158_v49 }
  0x65   :  { %761 = vmatpush.bf16.msra.mxu3 %v2167_v52 }
  0x66   :  { %627 = vmatpush.bf16.msrb.mxu2 %v2382_v63 }
  0x68   :  { %736 = vmatpush.bf16.msra.mxu1 %v2202_v61 }
  0x69   :  { %762 = vmatpush.bf16.msra.mxu3 %v2213_v1 }
  0x6a   :  { %745 = vmatpush.bf16.msra.mxu2 %v2256_v16 }
  0x6c   :  { %737 = vmatpush.bf16.msra.mxu1 %v2223_v4 }
  0x6d   :  { %763 = vmatpush.bf16.msra.mxu3 %v2236_v10 }
  0x6e   :  { %746 = vmatpush.bf16.msra.mxu2 %v2267_v20 }
  0x70   :  { %738 = vmatpush.bf16.msra.mxu1 %v2286_v27 }
  0x71   :  { %764 = vmatpush.bf16.msra.mxu3 %v2298_v33 }
  0x72   :  { %747 = vmatpush.bf16.msra.mxu2 %v2296_v32 }
  0x74   :  { %739 = vmatpush.bf16.msra.mxu1 %v2313_v40 }
  0x75   :  { %765 = vmatpush.bf16.msra.mxu3 %v2322_v45 }
  0x76   :  { %748 = vmatpush.bf16.msra.mxu2 %v2326_v46 }
  0x7a   :  { %749 = vmatpush.bf16.msra.mxu2 %v2340_v51 }
  0x7e   :  { %750 = vmatpush.bf16.msra.mxu2 %v2352_v56 }
  0x82   :  { %751 = vmatpush.bf16.msra.mxu2 %v2370_v5 }
  0x84   :  { %v2431_v6 = vpop.f32.mrf.mxu1 }
  0x85   :  { %2829 = vst [vmem:[#allocation5_spill] sm:$0xff] %v2431_v6 }
  0x86   :  { %752 = vmatpush.bf16.msra.mxu2 %v2382_v63 }
  0x8a   :  { %v2433_v2 = vpop.f32.mrf.mxu3 }
  0x8b   :  { %2830 = vst [vmem:[#allocation6_spill] sm:$0xff] %v2433_v2  ;;  %v2435_v3 = vpop.f32.mrf.mxu2 }
  0x8c   :  { %v2437_v7 = vpop.f32.mrf.mxu1 }
  0x8d   :  { %2831 = vst [vmem:[#allocation7_spill] sm:$0xff] %v2437_v7  ;;  %v114_v7 = vpop.f32.mrf.mxu0 }
  0x92   :  { %v2439_v8 = vpop.f32.mrf.mxu3 }
  0x93   :  { %2832 = vst [vmem:[#allocation8_spill] sm:$0xff] %v2439_v8  ;;  %v2441_v11 = vpop.f32.mrf.mxu2 }
  0x94   :  { %v143_v12 = vpop.f32.mrf.mxu1 }
  0x9a   :  { %v201_v17 = vpop.f32.mrf.mxu3 }
  0x9b   :  { %v177_v21 = vpop.f32.mrf.mxu2 }
  0x9c   :  { %v2449_v23 = vadd.f32 %v177_v21, %v2446_v14  ;;  %v145_v24 = vpop.f32.mrf.mxu1 }
  0x9d   :  { %v2451_v25 = vadd.f32 %v145_v24, %v45_v19 }
  0x9e   :  { %2833 = vst [vmem:[#allocation9_spill] sm:$0xff] %v2449_v23 }
  0xa2   :  { %v203_v31 = vpop.f32.mrf.mxu3 }
  0xa3   :  { %v179_v35 = vpop.f32.mrf.mxu2  ;;  %v2453_v36 = vadd.f32 %v203_v31, %v47_v30 }
  0xa4   :  { %v2456_v37 = vadd.f32 %v179_v35, %v2446_v14  ;;  %v148_v38 = vpop.f32.mrf.mxu1 }
  0xa5   :  { %v2458_v42 = vadd.f32 %v148_v38, %v45_v19 }
  0xa6   :  { %2834 = vst [vmem:[#allocation10_spill] sm:$0xff] %v2456_v37 }
  0xaa   :  { %v206_v44 = vpop.f32.mrf.mxu3 }
  0xab   :  { %v182_v47 = vpop.f32.mrf.mxu2  ;;  %v2460_v50 = vadd.f32 %v206_v44, %v47_v30 }
  0xac   :  { %v2463_v53 = vadd.f32 %v182_v47, %v2446_v14  ;;  %v150_v55 = vpop.f32.mrf.mxu1 }
  0xad   :  { %v2465_v57 = vadd.f32 %v150_v55, %v45_v19 }
  0xae   :  { %2835 = vst [vmem:[#allocation11_spill] sm:$0xff] %v2463_v53  ;;  %v2488_v53 = vperm.slane %v42_v13, 0 }
  0xaf   :  { %2836 = vst [vmem:[#allocation12_spill] sm:$0xff] %v2465_v57 }
  0xb2   :  { %v208_v58 = vpop.f32.mrf.mxu3 }
  0xb3   :  { %v184_v60 = vpop.f32.mrf.mxu2  ;;  %v2467_v62 = vadd.f32 %v208_v58, %v47_v30 }
  0xb4   :  { %v2470_v0 = vadd.f32 %v184_v60, %v2446_v14  ;;  %v153_v21 = vpop.f32.mrf.mxu1 }
  0xb5   :  { %2837 = vst [vmem:[#allocation13_spill] sm:$0xff] %v2467_v62  ;;  %v2472_v24 = vadd.f32 %v153_v21, %v45_v19  ;;  %v202_v62 = vadd.f32 %v201_v17, %v47_v30  ;;  %v173_v17 = vadd.f32 %v2435_v3, %v2446_v14 }
  0xb6   :  { %2838 = vst [vmem:[#allocation14_spill] sm:$0xff] %v2470_v0 }
  0xb7   :  { %2839 = vst [vmem:[#allocation15_spill] sm:$0xff] %v2472_v24 }
  0xba   :  { %v211_v31 = vpop.f32.mrf.mxu3 }
  0xbb   :  { %v187_v35 = vpop.f32.mrf.mxu2  ;;  %v2474_v38 = vadd.f32 %v211_v31, %v47_v30  ;;  %v115_v31 = vadd.f32 %v114_v7, %v2488_v53 }
  0xbc   :  { %v2477_v44 = vadd.f32 %v187_v35, %v2446_v14  ;;  %v155_v47 = vpop.f32.mrf.mxu1 }
  0xbd   :  { %2840 = vst [vmem:[#allocation16_spill] sm:$0xff] %v2474_v38  ;;  %v2479_v55 = vadd.f32 %v155_v47, %v45_v19 }
  0xbe   :  { %2841 = vst [vmem:[#allocation17_spill] sm:$0xff] %v2477_v44 }
  0xbf   :  { %2842 = vst [vmem:[#allocation18_spill] sm:$0xff] %v2479_v55 }
  0xc2   :  { %v213_v8 = vpop.f32.mrf.mxu3 }
  0xc3   :  { %v189_v2 = vpop.f32.mrf.mxu2  ;;  %v2481_v58 = vadd.f32 %v213_v8, %v47_v30 }
  0xc4   :  { %v2484_v60 = vadd.f32 %v189_v2, %v2446_v14  ;;  %v158_v0 = vpop.f32.mrf.mxu1 }
  0xc5   :  { %2843 = vst [vmem:[#allocation19_spill] sm:$0xff] %v2481_v58  ;;  %v2486_v21 = vadd.f32 %v158_v0, %v45_v19 }
  0xc6   :  { %2844 = vst [vmem:[#allocation20_spill] sm:$0xff] %v2484_v60  ;;  %v144_v60 = vadd.f32 %v143_v12, %v45_v19 }
  0xc7   :  { %2845 = vst [vmem:[#allocation21_spill] sm:$0xff] %v2486_v21 }
  0xca   :  { %v216_v35 = vpop.f32.mrf.mxu3 }
  0xcb   :  { %v2491_v44 = vadd.f32 %v216_v35, %v47_v30  ;;  %v478_v47 = vpop.f32.mrf.mxu2 }
  0xcc   :  { %v521_v55 = vadd.f32 %v478_v47, %v115_v31  ;;  %v160_v38 = vpop.f32.mrf.mxu1 }
  0xcd   :  { %2846 = vst [vmem:[#allocation22_spill] sm:$0xff] %v2491_v44  ;;  %v2493_v24 = vadd.f32 %v160_v38, %v45_v19 }
  0xce   :  { %v1737_v8 = vmul.f32 -1.442695, %v521_v55 }
  0xcf   :  { %2847 = vst [vmem:[#allocation23_spill] sm:$0xff] %v2493_v24 }
  0xd0   :  { %1845 = vpow2.f32 %v1737_v8 }
  0xd2   :  { %v218_v2 = vpop.f32.mrf.mxu3 }
  0xd3   :  { %v2495_v58 = vadd.f32 %v218_v2, %v47_v30  ;;  %v480_v0 = vpop.f32.mrf.mxu2 }
  0xd4   :  { %v491_v21 = vpop.f32.mrf.mxu1 }
  0xd5   :  { %2848 = vst [vmem:[#allocation24_spill] sm:$0xff] %v2495_v58  ;;  %v522_v13 = vadd.f32 %v491_v21, %v144_v60 }
  0xd6   :  { %v1846_v6 = vpop.eup %1845 }
  0xd7   :  { %v528_v37 = vadd.f32 1.0, %v1846_v6  ;;  %v1738_v7 = vmul.f32 -1.442695, %v522_v13 }
  0xd9   :  { %1847 = vrcp.f32 %v528_v37  ;;  %vm534_vm1 = vweird.f32 %v528_v37 }
  0xda   :  { %1849 = vpow2.f32 %v1738_v7  ;;  %v517_v35 = vpop.f32.mrf.mxu3 }
  0xdb   :  { %v504_v31 = vpop.f32.mrf.mxu2  ;;  %v524_v47 = vadd.f32 %v517_v35, %v202_v62 }
  0xdc   :  { %v493_v38 = vpop.f32.mrf.mxu1  ;;  %v523_v62 = vadd.f32 %v504_v31, %v173_v17 }
  0xdd   :  { %v1739_v24 = vmul.f32 -1.442695, %v524_v47  ;;  %v538_v38 = vand.u32 2147483647, %v528_v37 }
  0xdf   :  { %v1848_v55 = vpop.eup %1847  ;;  %1851 = vpow2.f32 %v1739_v24  ;;  %v540_v24 = vand.u32 2147483648, %v528_v37  ;;  %vm539_vm6 = vcmp.eq.f32.partialorder %v538_v38, 8.507059e+37 }
  0xe0   :  { %v1850_v8 = vpop.eup %1849  ;;  %v530_v12 = vmul.f32 %v1848_v55, %v528_v37  ;;  %vm535_vm2 = vweird.f32 %v1848_v55 }
  0xe1   :  { %v547_v19 = vadd.f32 1.0, %v1850_v8  ;;  %vm536_vm3 = vmor %vm534_vm1, %vm535_vm2 }
  0xe2   :  { %v531_v2 = vsub.f32 1.0, %v530_v12  ;;  %v519_v0 = vpop.f32.mrf.mxu3 }
  0xe3   :  { %1853 = vrcp.f32 %v547_v19  ;;  %v506_v60 = vpop.f32.mrf.mxu2  ;;  %v559_v8 = vand.u32 2147483648, %v547_v19  ;;  %vm553_vm5 = vweird.f32 %v547_v19 }
  0xe4   :  { %v532_v6 = vmul.f32 %v1848_v55, %v531_v2  ;;  %v557_v60 = vand.u32 2147483647, %v547_v19 }
  0xe5   :  { %v1852_v21 = vpop.eup %1851  ;;  %v560_v17 = vor.u32 1.1754944e-38, %v559_v8 }
  0xe6   :  { %v567_v13 = vadd.f32 1.0, %v1852_v21  ;;  %v533_v35 = vadd.f32 %v1848_v55, %v532_v6  ;;  %v541_v21 = vor.u32 1.1754944e-38, %v540_v24  ;;  %vm558_vm8 = vcmp.eq.f32.partialorder %v557_v60, 8.507059e+37 }
  0xe8   :  { %1855 = vrcp.f32 %v567_v13  ;;  %v537_v2 = vsel %vm536_vm3, %v1848_v55, %v533_v35  ;;  %vm573_vm10 = vweird.f32 %v567_v13  ;;  %v577_v35 = vand.u32 2147483647, %v567_v13 }
  0xe9   :  { %v1854_v30 = vpop.eup %1853  ;;  %1857 = vtanh.f32 %v523_v62  ;;  %v542_v6 = vsel %vm539_vm6, %v541_v21, %v537_v2 }
  0xea   :  { %v549_v7 = vmul.f32 %v1854_v30, %v547_v19  ;;  %vm554_vm4 = vweird.f32 %v1854_v30  ;;  %v579_v19 = vand.u32 2147483648, %v567_v13  ;;  %vm578_vm12 = vcmp.eq.f32.partialorder %v577_v35, 8.507059e+37 }
  0xeb   :  { %vm555_vm7 = vmor %vm553_vm5, %vm554_vm4 }
  0xec   :  { %v550_v47 = vsub.f32 1.0, %v549_v7  ;;  %v580_v38 = vor.u32 1.1754944e-38, %v579_v19 }
  0xee   :  { %v1856_v12 = vpop.eup %1855  ;;  %v551_v0 = vmul.f32 %v1854_v30, %v550_v47 }
  0xef   :  { %v569_v3 = vmul.f32 %v1856_v12, %v567_v13  ;;  %v1858_v37 = vpop.eup %1857  ;;  %vm574_vm9 = vweird.f32 %v1856_v12 }
  0xf0   :  { %v552_v31 = vadd.f32 %v1854_v30, %v551_v0  ;;  %v584_v23 = vmul.f32 %v1858_v37, %v542_v6  ;;  %vm575_vm11 = vmor %vm573_vm10, %vm574_vm9 }
  0xf1   :  { %v570_v58 = vsub.f32 1.0, %v569_v3 }
  0xf2   :  { %v556_v44 = vsel %vm555_vm7, %v1854_v30, %v552_v31 }
  0xf3   :  { %v561_v7 = vsel %vm558_vm8, %v560_v17, %v556_v44  ;;  %v571_v57 = vmul.f32 %v1856_v12, %v570_v58 }
  0xf4   :  { %v583_v62 = vmul.f32 0.0, %v561_v7 }
  0xf5   :  { %v572_v55 = vadd.f32 %v1856_v12, %v571_v57 }
  0xf6   :  { %v2499_v47 = vadd.f32 %v584_v23, %v583_v62  ;;  %v116_v23 = vpop.f32.mrf.mxu0 }
  0xf7   :  { %v576_v24 = vsel %vm575_vm11, %v1856_v12, %v572_v55  ;;  %v117_v13 = vadd.f32 %v116_v23, %v2488_v53 }
  0xf8   :  { %1859 = vtanh.f32 %v2499_v47  ;;  %v581_v8 = vsel %vm578_vm12, %v580_v38, %v576_v24 }
  0xfe   :  { %v1860_v30 = vpop.eup %1859  ;;  %v2538_v57 = vpop.f32.mrf.mxu0 }
  0xff   :  { %v2502_v0 = vmul.f32 %v1860_v30, %v581_v8 }
 0x101   :  { %v593_v44 = vpack.c.bf16 %v2502_v0, %v2502_v0 }
 0x103   :  { %602 = vmatmul.bf16.vlgmr.msrb.gmra.mxu0 %v593_v44  ;;  %615 = vmatmul.bf16.vlgmr.msrb.gmra.mxu1 %v593_v44 }
 0x104   :  { %628 = vmatmul.bf16.vlgmr.msrb.gmra.mxu2 %v593_v44  ;;  %641 = vmatmul.bf16.vlgmr.msrb.gmra.mxu3 %v593_v44  ;;  %v175_v44 = vadd.f32 %v2441_v11, %v2446_v14 }
 0x105   :  { %844 = vmatpush.bf16.msrb.mxu0 %v2057_v18  ;;  %857 = vmatpush.bf16.msrb.mxu1 %v2072_v22 }
 0x106   :  { %870 = vmatpush.bf16.msrb.mxu2 %v2256_v16  ;;  %883 = vmatpush.bf16.msrb.mxu3 %v2085_v26  ;;  %v2540_v58 = vpop.f32.mrf.mxu0 }
 0x109   :  { %845 = vmatpush.bf16.msrb.mxu0 %v2092_v28  ;;  %858 = vmatpush.bf16.msrb.mxu1 %v2094_v29 }
 0x10a   :  { %871 = vmatpush.bf16.msrb.mxu2 %v2267_v20  ;;  %884 = vmatpush.bf16.msrb.mxu3 %v2109_v34 }
 0x10d   :  { %846 = vmatpush.bf16.msrb.mxu0 %v2128_v39  ;;  %859 = vmatpush.bf16.msrb.mxu1 %v2133_v41 }
 0x10e   :  { %872 = vmatpush.bf16.msrb.mxu2 %v2296_v32  ;;  %885 = vmatpush.bf16.msrb.mxu3 %v2139_v43 }
 0x111   :  { %847 = vmatpush.bf16.msrb.mxu0 %v2155_v48  ;;  %860 = vmatpush.bf16.msrb.mxu1 %v2158_v49 }
 0x112   :  { %873 = vmatpush.bf16.msrb.mxu2 %v2326_v46  ;;  %886 = vmatpush.bf16.msrb.mxu3 %v2167_v52 }
 0x115   :  { %848 = vmatpush.bf16.msrb.mxu0 %v2174_v54  ;;  %861 = vmatpush.bf16.msrb.mxu1 %v2202_v61 }
 0x116   :  { %874 = vmatpush.bf16.msrb.mxu2 %v2340_v51  ;;  %887 = vmatpush.bf16.msrb.mxu3 %v2213_v1 }
 0x119   :  { %849 = vmatpush.bf16.msrb.mxu0 %v2197_v59  ;;  %862 = vmatpush.bf16.msrb.mxu1 %v2223_v4 }
 0x11a   :  { %875 = vmatpush.bf16.msrb.mxu2 %v2352_v56  ;;  %888 = vmatpush.bf16.msrb.mxu3 %v2236_v10 }
 0x11d   :  { %850 = vmatpush.bf16.msrb.mxu0 %v2234_v9  ;;  %863 = vmatpush.bf16.msrb.mxu1 %v2286_v27 }
 0x11e   :  { %876 = vmatpush.bf16.msrb.mxu2 %v2370_v5  ;;  %889 = vmatpush.bf16.msrb.mxu3 %v2298_v33 }
 0x121   :  { %851 = vmatpush.bf16.msrb.mxu0 %v2254_v15  ;;  %864 = vmatpush.bf16.msrb.mxu1 %v2313_v40 }
 0x122   :  { %877 = vmatpush.bf16.msrb.mxu2 %v2382_v63  ;;  %890 = vmatpush.bf16.msrb.mxu3 %v2322_v45 }
 0x180   :  { %v603_v12 = vpop.f32.mrf.mxu0  ;;  %v616_v2 = vpop.f32.mrf.mxu1 }
 0x181   :  { %v646_v60 = vadd.f32 %v603_v12, %v117_v13  ;;  %v647_v21 = vadd.f32 %v616_v2, %v2451_v25 }
 0x183   :  { %v1740_v3 = vmul.f32 -1.442695, %v646_v60  ;;  %v1741_v31 = vmul.f32 -1.442695, %v647_v21 }
 0x185   :  { %1861 = vpow2.f32 %v1740_v3 }
 0x186   :  { %1863 = vpow2.f32 %v1741_v31 }
 0x187   :  { %v629_v17 = vpop.f32.mrf.mxu2  ;;  %v642_v6 = vpop.f32.mrf.mxu3 }
 0x188   :  { %v649_v37 = vadd.f32 %v642_v6, %v2453_v36  ;;  %v605_v7 = vpop.f32.mrf.mxu0  ;;  %v618_v62 = vpop.f32.mrf.mxu1  ;;  %v648_v12 = vadd.f32 %v629_v17, %v175_v44 }
 0x18a   :  { %v1742_v55 = vmul.f32 -1.442695, %v649_v37 }
 0x18b   :  { %v1862_v19 = vpop.eup %1861 }
 0x18c   :  { %v1864_v35 = vpop.eup %1863  ;;  %v653_v24 = vadd.f32 1.0, %v1862_v19  ;;  %1865 = vpow2.f32 %v1742_v55 }
 0x18d   :  { %v672_v38 = vadd.f32 1.0, %v1864_v35 }
 0x18e   :  { %1867 = vrcp.f32 %v653_v24  ;;  %v665_v31 = vand.u32 2147483648, %v653_v24  ;;  %v663_v7 = vand.u32 2147483647, %v653_v24  ;;  %vm659_vm15 = vweird.f32 %v653_v24 }
 0x18f   :  { %1869 = vrcp.f32 %v672_v38  ;;  %v631_v30 = vpop.f32.mrf.mxu2  ;;  %v644_v25 = vpop.f32.mrf.mxu3  ;;  %v684_v6 = vand.u32 2147483648, %v672_v38  ;;  %v682_v55 = vand.u32 2147483647, %v672_v38  ;;  %vm678_vm0 = vweird.f32 %v672_v38 }
 0x190   :  { %v666_v14 = vor.u32 1.1754944e-38, %v665_v31  ;;  %vm664_vm3 = vcmp.eq.f32.partialorder %v663_v7, 8.507059e+37 }
 0x191   :  { %v685_v30 = vor.u32 1.1754944e-38, %v684_v6  ;;  %vm683_vm4 = vcmp.eq.f32.partialorder %v682_v55, 8.507059e+37 }
 0x192   :  { %v1866_v8 = vpop.eup %1865 }
 0x193   :  { %v692_v23 = vadd.f32 1.0, %v1866_v8 }
 0x194   :  { %v1868_v13 = vpop.eup %1867 }
 0x195   :  { %v1870_v36 = vpop.eup %1869  ;;  %v655_v2 = vmul.f32 %v1868_v13, %v653_v24  ;;  %1871 = vrcp.f32 %v692_v23  ;;  %vm660_vm13 = vweird.f32 %v1868_v13  ;;  %v704_v31 = vand.u32 2147483648, %v692_v23 }
 0x196   :  { %v674_v60 = vmul.f32 %v1870_v36, %v672_v38  ;;  %1873 = vtanh.f32 %v648_v12  ;;  %vm679_vm14 = vweird.f32 %v1870_v36  ;;  %vm661_vm1 = vmor %vm659_vm15, %vm660_vm13  ;;  %vm698_vm6 = vweird.f32 %v692_v23 }
 0x197   :  { %v656_v21 = vsub.f32 1.0, %v655_v2  ;;  %vm680_vm2 = vmor %vm678_vm0, %vm679_vm14  ;;  %v705_v7 = vor.u32 1.1754944e-38, %v704_v31 }
 0x198   :  { %v675_v3 = vsub.f32 1.0, %v674_v60 }
 0x199   :  { %v657_v37 = vmul.f32 %v1868_v13, %v656_v21 }
 0x19a   :  { %v676_v62 = vmul.f32 %v1870_v36, %v675_v3 }
 0x19b   :  { %v1872_v19 = vpop.eup %1871  ;;  %v658_v11 = vadd.f32 %v1868_v13, %v657_v37 }
 0x19c   :  { %v677_v17 = vadd.f32 %v1870_v36, %v676_v62  ;;  %v694_v35 = vmul.f32 %v1872_v19, %v692_v23  ;;  %v1874_v8 = vpop.eup %1873  ;;  %vm699_vm5 = vweird.f32 %v1872_v19 }
 0x19d   :  { %v662_v25 = vsel %vm661_vm1, %v1868_v13, %v658_v11  ;;  %v702_v13 = vand.u32 2147483647, %v692_v23  ;;  %vm700_vm7 = vmor %vm698_vm6, %vm699_vm5  ;;  %v120_v23 = vadd.f32 %v2538_v57, %v2488_v53 }
 0x19e   :  { %v667_v44 = vsel %vm664_vm3, %v666_v14, %v662_v25  ;;  %v681_v12 = vsel %vm680_vm2, %v1870_v36, %v677_v17  ;;  %v695_v2 = vsub.f32 1.0, %v694_v35 }
 0x19f   :  { %v686_v60 = vsel %vm683_vm4, %v685_v30, %v681_v12  ;;  %v709_v21 = vmul.f32 %v1874_v8, %v667_v44  ;;  %vm703_vm8 = vcmp.eq.f32.partialorder %v702_v13, 8.507059e+37 }
 0x1a0   :  { %v708_v3 = vmul.f32 %v686_v60, %v2499_v47  ;;  %v696_v37 = vmul.f32 %v1872_v19, %v695_v2 }
 0x1a2   :  { %v2548_v24 = vadd.f32 %v709_v21, %v708_v3  ;;  %v697_v38 = vadd.f32 %v1872_v19, %v696_v37 }
 0x1a4   :  { %1875 = vtanh.f32 %v2548_v24  ;;  %v701_v6 = vsel %vm700_vm7, %v1872_v19, %v697_v38 }
 0x1a5   :  { %v706_v62 = vsel %vm703_vm8, %v705_v7, %v701_v6  ;;  %v2849_v7 = vld [vmem:[#allocation9_spill] sm:$0xff] }
 0x1aa   :  { %v1876_v36 = vpop.eup %1875 }
 0x1ab   :  { %v2551_v55 = vmul.f32 %v1876_v36, %v706_v62 }
 0x1ad   :  { %v718_v47 = vpack.c.bf16 %v2551_v55, %v2551_v55 }
 0x1af   :  { %727 = vmatmul.bf16.vlgmr.msra.gmra.mxu0 %v718_v47  ;;  %740 = vmatmul.bf16.vlgmr.msra.gmra.mxu1 %v718_v47 }
 0x1b0   :  { %753 = vmatmul.bf16.vlgmr.msra.gmra.mxu2 %v718_v47  ;;  %766 = vmatmul.bf16.vlgmr.msra.gmra.mxu3 %v718_v47 }
 0x1b1   :  { %969 = vmatpush.bf16.msra.mxu0 %v2057_v18  ;;  %982 = vmatpush.bf16.msra.mxu1 %v2072_v22 }
 0x1b2   :  { %995 = vmatpush.bf16.msra.mxu2 %v2256_v16  ;;  %1008 = vmatpush.bf16.msra.mxu3 %v2085_v26 }
 0x1b5   :  { %970 = vmatpush.bf16.msra.mxu0 %v2092_v28  ;;  %983 = vmatpush.bf16.msra.mxu1 %v2094_v29 }
 0x1b6   :  { %996 = vmatpush.bf16.msra.mxu2 %v2267_v20  ;;  %1009 = vmatpush.bf16.msra.mxu3 %v2109_v34 }
 0x1b9   :  { %971 = vmatpush.bf16.msra.mxu0 %v2128_v39  ;;  %984 = vmatpush.bf16.msra.mxu1 %v2133_v41 }
 0x1ba   :  { %997 = vmatpush.bf16.msra.mxu2 %v2296_v32  ;;  %1010 = vmatpush.bf16.msra.mxu3 %v2139_v43 }
 0x1bd   :  { %972 = vmatpush.bf16.msra.mxu0 %v2155_v48  ;;  %985 = vmatpush.bf16.msra.mxu1 %v2158_v49 }
 0x1be   :  { %998 = vmatpush.bf16.msra.mxu2 %v2326_v46  ;;  %1011 = vmatpush.bf16.msra.mxu3 %v2167_v52 }
 0x1c1   :  { %973 = vmatpush.bf16.msra.mxu0 %v2174_v54  ;;  %986 = vmatpush.bf16.msra.mxu1 %v2202_v61 }
 0x1c2   :  { %999 = vmatpush.bf16.msra.mxu2 %v2340_v51  ;;  %1012 = vmatpush.bf16.msra.mxu3 %v2213_v1 }
 0x1c5   :  { %974 = vmatpush.bf16.msra.mxu0 %v2197_v59  ;;  %987 = vmatpush.bf16.msra.mxu1 %v2223_v4 }
 0x1c6   :  { %1000 = vmatpush.bf16.msra.mxu2 %v2352_v56  ;;  %1013 = vmatpush.bf16.msra.mxu3 %v2236_v10 }
 0x1c9   :  { %975 = vmatpush.bf16.msra.mxu0 %v2234_v9  ;;  %988 = vmatpush.bf16.msra.mxu1 %v2286_v27 }
 0x1ca   :  { %1001 = vmatpush.bf16.msra.mxu2 %v2370_v5  ;;  %1014 = vmatpush.bf16.msra.mxu3 %v2298_v33 }
 0x1cd   :  { %976 = vmatpush.bf16.msra.mxu0 %v2254_v15  ;;  %989 = vmatpush.bf16.msra.mxu1 %v2313_v40 }
 0x1ce   :  { %1002 = vmatpush.bf16.msra.mxu2 %v2382_v63  ;;  %1015 = vmatpush.bf16.msra.mxu3 %v2322_v45 }
 0x22c   :  { %v728_v19 = vpop.f32.mrf.mxu0  ;;  %v741_v11 = vpop.f32.mrf.mxu1 }
 0x22d   :  { %v771_v14 = vadd.f32 %v728_v19, %v120_v23  ;;  %v772_v17 = vadd.f32 %v741_v11, %v2458_v42 }
 0x22f   :  { %v1743_v35 = vmul.f32 -1.442695, %v771_v14  ;;  %v1744_v30 = vmul.f32 -1.442695, %v772_v17 }
 0x231   :  { %1877 = vpow2.f32 %v1743_v35 }
 0x232   :  { %1879 = vpow2.f32 %v1744_v30 }
 0x233   :  { %v754_v25 = vpop.f32.mrf.mxu2  ;;  %v767_v8 = vpop.f32.mrf.mxu3 }
 0x234   :  { %v774_v44 = vadd.f32 %v767_v8, %v2460_v50  ;;  %v730_v12 = vpop.f32.mrf.mxu0  ;;  %v743_v2 = vpop.f32.mrf.mxu1  ;;  %v773_v36 = vadd.f32 %v754_v25, %v2849_v7 }
 0x236   :  { %v1745_v60 = vmul.f32 -1.442695, %v774_v44 }
 0x237   :  { %v1878_v21 = vpop.eup %1877 }
 0x238   :  { %v1880_v3 = vpop.eup %1879  ;;  %v778_v37 = vadd.f32 1.0, %v1878_v21  ;;  %1881 = vpow2.f32 %v1745_v60 }
 0x239   :  { %v797_v57 = vadd.f32 1.0, %v1880_v3 }
 0x23a   :  { %1883 = vrcp.f32 %v778_v37  ;;  %v790_v11 = vand.u32 2147483648, %v778_v37  ;;  %v788_v35 = vand.u32 2147483647, %v778_v37  ;;  %vm784_vm11 = vweird.f32 %v778_v37 }
 0x23b   :  { %1885 = vrcp.f32 %v797_v57  ;;  %v756_v38 = vpop.f32.mrf.mxu2  ;;  %v769_v42 = vpop.f32.mrf.mxu3  ;;  %v809_v14 = vand.u32 2147483648, %v797_v57  ;;  %v807_v8 = vand.u32 2147483647, %v797_v57  ;;  %vm803_vm12 = vweird.f32 %v797_v57 }
 0x23c   :  { %v791_v25 = vor.u32 1.1754944e-38, %v790_v11  ;;  %vm789_vm15 = vcmp.eq.f32.partialorder %v788_v35, 8.507059e+37 }
 0x23d   :  { %v810_v21 = vor.u32 1.1754944e-38, %v809_v14  ;;  %vm808_vm0 = vcmp.eq.f32.partialorder %v807_v8, 8.507059e+37 }
 0x23e   :  { %v1882_v31 = vpop.eup %1881 }
 0x23f   :  { %v817_v13 = vadd.f32 1.0, %v1882_v31 }
 0x240   :  { %v1884_v6 = vpop.eup %1883 }
 0x241   :  { %v1886_v62 = vpop.eup %1885  ;;  %v780_v47 = vmul.f32 %v1884_v6, %v778_v37  ;;  %1887 = vrcp.f32 %v817_v13  ;;  %vm785_vm9 = vweird.f32 %v1884_v6  ;;  %vm823_vm2 = vweird.f32 %v817_v13 }
 0x242   :  { %v799_v50 = vmul.f32 %v1886_v62, %v797_v57  ;;  %1889 = vtanh.f32 %v773_v36  ;;  %vm804_vm10 = vweird.f32 %v1886_v62  ;;  %vm786_vm13 = vmor %vm784_vm11, %vm785_vm9 }
 0x243   :  { %v781_v23 = vsub.f32 1.0, %v780_v47  ;;  %vm805_vm14 = vmor %vm803_vm12, %vm804_vm10 }
 0x244   :  { %v800_v19 = vsub.f32 1.0, %v799_v50 }
 0x245   :  { %v782_v17 = vmul.f32 %v1884_v6, %v781_v23 }
 0x246   :  { %v801_v30 = vmul.f32 %v1886_v62, %v800_v19  ;;  %v829_v19 = vand.u32 2147483648, %v817_v13 }
 0x247   :  { %v1888_v44 = vpop.eup %1887  ;;  %v783_v12 = vadd.f32 %v1884_v6, %v782_v17 }
 0x248   :  { %v802_v2 = vadd.f32 %v1886_v62, %v801_v30  ;;  %v819_v60 = vmul.f32 %v1888_v44, %v817_v13  ;;  %v1890_v38 = vpop.eup %1889  ;;  %vm824_vm1 = vweird.f32 %v1888_v44  ;;  %v830_v14 = vor.u32 1.1754944e-38, %v829_v19 }
 0x249   :  { %v787_v3 = vsel %vm786_vm13, %v1884_v6, %v783_v12  ;;  %v827_v6 = vand.u32 2147483647, %v817_v13  ;;  %vm825_vm3 = vmor %vm823_vm2, %vm824_vm1  ;;  %v122_v13 = vadd.f32 %v2540_v58, %v2488_v53  ;;  %v2850_v12 = vld [vmem:[#allocation12_spill] sm:$0xff] }
 0x24a   :  { %v792_v42 = vsel %vm789_vm15, %v791_v25, %v787_v3  ;;  %v806_v31 = vsel %vm805_vm14, %v1886_v62, %v802_v2  ;;  %v820_v7 = vsub.f32 1.0, %v819_v60 }
 0x24b   :  { %v811_v36 = vsel %vm808_vm0, %v810_v21, %v806_v31  ;;  %v834_v47 = vmul.f32 %v1890_v38, %v792_v42  ;;  %vm828_vm4 = vcmp.eq.f32.partialorder %v827_v6, 8.507059e+37  ;;  %v2851_v38 = vld [vmem:[#allocation13_spill] sm:$0xff] }
 0x24c   :  { %v833_v50 = vmul.f32 %v811_v36, %v2548_v24  ;;  %v821_v23 = vmul.f32 %v1888_v44, %v820_v7 }
 0x24e   :  { %v2593_v37 = vadd.f32 %v834_v47, %v833_v50  ;;  %v822_v57 = vadd.f32 %v1888_v44, %v821_v23 }
 0x250   :  { %1891 = vtanh.f32 %v2593_v37  ;;  %v826_v11 = vsel %vm825_vm3, %v1888_v44, %v822_v57 }
 0x251   :  { %v831_v17 = vsel %vm828_vm4, %v830_v14, %v826_v11 }
 0x256   :  { %v1892_v62 = vpop.eup %1891 }
 0x257   :  { %v2596_v35 = vmul.f32 %v1892_v62, %v831_v17  ;;  %v2852_v62 = vld [vmem:[#allocation10_spill] sm:$0xff] }
 0x259   :  { %v843_v24 = vpack.c.bf16 %v2596_v35, %v2596_v35 }
 0x25b   :  { %852 = vmatmul.bf16.vlgmr.msrb.gmra.mxu0 %v843_v24  ;;  %865 = vmatmul.bf16.vlgmr.msrb.gmra.mxu1 %v843_v24 }
 0x25c   :  { %878 = vmatmul.bf16.vlgmr.msrb.gmra.mxu2 %v843_v24  ;;  %891 = vmatmul.bf16.vlgmr.msrb.gmra.mxu3 %v843_v24 }
 0x25d   :  { %1094 = vmatpush.bf16.msrb.mxu0 %v2057_v18  ;;  %1107 = vmatpush.bf16.msrb.mxu1 %v2072_v22 }
 0x25e   :  { %1120 = vmatpush.bf16.msrb.mxu2 %v2256_v16  ;;  %1133 = vmatpush.bf16.msrb.mxu3 %v2085_v26 }
 0x261   :  { %1095 = vmatpush.bf16.msrb.mxu0 %v2092_v28  ;;  %1108 = vmatpush.bf16.msrb.mxu1 %v2094_v29 }
 0x262   :  { %1121 = vmatpush.bf16.msrb.mxu2 %v2267_v20  ;;  %1134 = vmatpush.bf16.msrb.mxu3 %v2109_v34 }
 0x265   :  { %1096 = vmatpush.bf16.msrb.mxu0 %v2128_v39  ;;  %1109 = vmatpush.bf16.msrb.mxu1 %v2133_v41 }
 0x266   :  { %1122 = vmatpush.bf16.msrb.mxu2 %v2296_v32  ;;  %1135 = vmatpush.bf16.msrb.mxu3 %v2139_v43 }
 0x269   :  { %1097 = vmatpush.bf16.msrb.mxu0 %v2155_v48  ;;  %1110 = vmatpush.bf16.msrb.mxu1 %v2158_v49 }
 0x26a   :  { %1123 = vmatpush.bf16.msrb.mxu2 %v2326_v46  ;;  %1136 = vmatpush.bf16.msrb.mxu3 %v2167_v52 }
 0x26d   :  { %1098 = vmatpush.bf16.msrb.mxu0 %v2174_v54  ;;  %1111 = vmatpush.bf16.msrb.mxu1 %v2202_v61 }
 0x26e   :  { %1124 = vmatpush.bf16.msrb.mxu2 %v2340_v51  ;;  %1137 = vmatpush.bf16.msrb.mxu3 %v2213_v1 }
 0x271   :  { %1099 = vmatpush.bf16.msrb.mxu0 %v2197_v59  ;;  %1112 = vmatpush.bf16.msrb.mxu1 %v2223_v4 }
 0x272   :  { %1125 = vmatpush.bf16.msrb.mxu2 %v2352_v56  ;;  %1138 = vmatpush.bf16.msrb.mxu3 %v2236_v10 }
 0x275   :  { %1100 = vmatpush.bf16.msrb.mxu0 %v2234_v9  ;;  %1113 = vmatpush.bf16.msrb.mxu1 %v2286_v27 }
 0x276   :  { %1126 = vmatpush.bf16.msrb.mxu2 %v2370_v5  ;;  %1139 = vmatpush.bf16.msrb.mxu3 %v2298_v33 }
 0x279   :  { %1101 = vmatpush.bf16.msrb.mxu0 %v2254_v15  ;;  %1114 = vmatpush.bf16.msrb.mxu1 %v2313_v40 }
 0x27a   :  { %1127 = vmatpush.bf16.msrb.mxu2 %v2382_v63  ;;  %1140 = vmatpush.bf16.msrb.mxu3 %v2322_v45 }
 0x2d8   :  { %v853_v30 = vpop.f32.mrf.mxu0  ;;  %v866_v8 = vpop.f32.mrf.mxu1 }
 0x2d9   :  { %v896_v44 = vadd.f32 %v853_v30, %v122_v13  ;;  %v897_v25 = vadd.f32 %v866_v8, %v2850_v12 }
 0x2db   :  { %v1746_v2 = vmul.f32 -1.442695, %v896_v44  ;;  %v1747_v60 = vmul.f32 -1.442695, %v897_v25 }
 0x2dd   :  { %1893 = vpow2.f32 %v1746_v2 }
 0x2de   :  { %1895 = vpow2.f32 %v1747_v60 }
 0x2df   :  { %v879_v21 = vpop.f32.mrf.mxu2  ;;  %v892_v3 = vpop.f32.mrf.mxu3 }
 0x2e0   :  { %v899_v42 = vadd.f32 %v892_v3, %v2851_v38  ;;  %v855_v31 = vpop.f32.mrf.mxu0  ;;  %v868_v7 = vpop.f32.mrf.mxu1  ;;  %v898_v17 = vadd.f32 %v879_v21, %v2852_v62 }
 0x2e2   :  { %v1748_v36 = vmul.f32 -1.442695, %v899_v42 }
 0x2e3   :  { %v1894_v47 = vpop.eup %1893 }
 0x2e4   :  { %v1896_v50 = vpop.eup %1895  ;;  %v903_v23 = vadd.f32 1.0, %v1894_v47  ;;  %1897 = vpow2.f32 %v1748_v36 }
 0x2e5   :  { %v922_v58 = vadd.f32 1.0, %v1896_v50 }
 0x2e6   :  { %1899 = vrcp.f32 %v903_v23  ;;  %v915_v12 = vand.u32 2147483648, %v903_v23  ;;  %v913_v60 = vand.u32 2147483647, %v903_v23  ;;  %vm909_vm7 = vweird.f32 %v903_v23 }
 0x2e7   :  { %1901 = vrcp.f32 %v922_v58  ;;  %v881_v57 = vpop.f32.mrf.mxu2  ;;  %v894_v19 = vpop.f32.mrf.mxu3  ;;  %v934_v25 = vand.u32 2147483648, %v922_v58  ;;  %v932_v38 = vand.u32 2147483647, %v922_v58  ;;  %vm928_vm8 = vweird.f32 %v922_v58 }
 0x2e8   :  { %v916_v21 = vor.u32 1.1754944e-38, %v915_v12  ;;  %vm914_vm11 = vcmp.eq.f32.partialorder %v913_v60, 8.507059e+37 }
 0x2e9   :  { %v935_v47 = vor.u32 1.1754944e-38, %v934_v25  ;;  %vm933_vm12 = vcmp.eq.f32.partialorder %v932_v38, 8.507059e+37 }
 0x2ea   :  { %v1898_v6 = vpop.eup %1897 }
 0x2eb   :  { %v942_v11 = vadd.f32 1.0, %v1898_v6 }
 0x2ec   :  { %v1900_v14 = vpop.eup %1899 }
 0x2ed   :  { %v1902_v24 = vpop.eup %1901  ;;  %v905_v13 = vmul.f32 %v1900_v14, %v903_v23  ;;  %1903 = vrcp.f32 %v942_v11  ;;  %vm910_vm5 = vweird.f32 %v1900_v14  ;;  %vm948_vm14 = vweird.f32 %v942_v11 }
 0x2ee   :  { %v924_v30 = vmul.f32 %v1902_v24, %v922_v58  ;;  %1905 = vtanh.f32 %v898_v17  ;;  %vm929_vm6 = vweird.f32 %v1902_v24  ;;  %vm911_vm9 = vmor %vm909_vm7, %vm910_vm5 }
 0x2ef   :  { %v906_v8 = vsub.f32 1.0, %v905_v13  ;;  %vm930_vm10 = vmor %vm928_vm8, %vm929_vm6 }
 0x2f0   :  { %v925_v44 = vsub.f32 1.0, %v924_v30 }
 0x2f1   :  { %v907_v2 = vmul.f32 %v1900_v14, %v906_v8 }
 0x2f2   :  { %v926_v3 = vmul.f32 %v1902_v24, %v925_v44  ;;  %v954_v44 = vand.u32 2147483648, %v942_v11 }
 0x2f3   :  { %v1904_v42 = vpop.eup %1903  ;;  %v908_v31 = vadd.f32 %v1900_v14, %v907_v2 }
 0x2f4   :  { %v927_v7 = vadd.f32 %v1902_v24, %v926_v3  ;;  %v944_v36 = vmul.f32 %v1904_v42, %v942_v11  ;;  %v1906_v57 = vpop.eup %1905  ;;  %vm949_vm13 = vweird.f32 %v1904_v42  ;;  %v955_v25 = vor.u32 1.1754944e-38, %v954_v44 }
 0x2f5   :  { %v912_v50 = vsel %vm911_vm9, %v1900_v14, %v908_v31  ;;  %v952_v14 = vand.u32 2147483647, %v942_v11  ;;  %vm950_vm15 = vmor %vm948_vm14, %vm949_vm13  ;;  %v2853_v11 = vld [vmem:[#allocation5_spill] sm:$0xff] }
 0x2f6   :  { %v917_v19 = vsel %vm914_vm11, %v916_v21, %v912_v50  ;;  %v931_v6 = vsel %vm930_vm10, %v1902_v24, %v927_v7  ;;  %v945_v62 = vsub.f32 1.0, %v944_v36  ;;  %v125_v3 = vadd.f32 %v2853_v11, %v2488_v53  ;;  %v2854_v21 = vld [vmem:[#allocation15_spill] sm:$0xff] }
 0x2f7   :  { %v936_v17 = vsel %vm933_vm12, %v935_v47, %v931_v6  ;;  %v959_v13 = vmul.f32 %v1906_v57, %v917_v19  ;;  %vm953_vm0 = vcmp.eq.f32.partialorder %v952_v14, 8.507059e+37  ;;  %v2855_v19 = vld [vmem:[#allocation16_spill] sm:$0xff] }
 0x2f8   :  { %v958_v30 = vmul.f32 %v936_v17, %v2593_v37  ;;  %v946_v8 = vmul.f32 %v1904_v42, %v945_v62 }
 0x2fa   :  { %v2638_v23 = vadd.f32 %v959_v13, %v958_v30  ;;  %v947_v58 = vadd.f32 %v1904_v42, %v946_v8 }
 0x2fc   :  { %1907 = vtanh.f32 %v2638_v23  ;;  %v951_v12 = vsel %vm950_vm15, %v1904_v42, %v947_v58 }
 0x2fd   :  { %v956_v2 = vsel %vm953_vm0, %v955_v25, %v951_v12 }
 0x302   :  { %v1908_v24 = vpop.eup %1907 }
 0x303   :  { %v2641_v60 = vmul.f32 %v1908_v24, %v956_v2 }
 0x305   :  { %v968_v37 = vpack.c.bf16 %v2641_v60, %v2641_v60 }
 0x307   :  { %977 = vmatmul.bf16.vlgmr.msra.gmra.mxu0 %v968_v37  ;;  %990 = vmatmul.bf16.vlgmr.msra.gmra.mxu1 %v968_v37 }
 0x308   :  { %1003 = vmatmul.bf16.vlgmr.msra.gmra.mxu2 %v968_v37  ;;  %1016 = vmatmul.bf16.vlgmr.msra.gmra.mxu3 %v968_v37  ;;  %v2856_v37 = vld [vmem:[#allocation11_spill] sm:$0xff] }
 0x309   :  { %1219 = vmatpush.bf16.msra.mxu0 %v2057_v18  ;;  %1232 = vmatpush.bf16.msra.mxu1 %v2072_v22 }
 0x30a   :  { %1245 = vmatpush.bf16.msra.mxu2 %v2256_v16  ;;  %1258 = vmatpush.bf16.msra.mxu3 %v2085_v26 }
 0x30d   :  { %1220 = vmatpush.bf16.msra.mxu0 %v2092_v28  ;;  %1233 = vmatpush.bf16.msra.mxu1 %v2094_v29 }
 0x30e   :  { %1246 = vmatpush.bf16.msra.mxu2 %v2267_v20  ;;  %1259 = vmatpush.bf16.msra.mxu3 %v2109_v34 }
 0x311   :  { %1221 = vmatpush.bf16.msra.mxu0 %v2128_v39  ;;  %1234 = vmatpush.bf16.msra.mxu1 %v2133_v41 }
 0x312   :  { %1247 = vmatpush.bf16.msra.mxu2 %v2296_v32  ;;  %1260 = vmatpush.bf16.msra.mxu3 %v2139_v43 }
 0x315   :  { %1222 = vmatpush.bf16.msra.mxu0 %v2155_v48  ;;  %1235 = vmatpush.bf16.msra.mxu1 %v2158_v49 }
 0x316   :  { %1248 = vmatpush.bf16.msra.mxu2 %v2326_v46  ;;  %1261 = vmatpush.bf16.msra.mxu3 %v2167_v52 }
 0x319   :  { %1223 = vmatpush.bf16.msra.mxu0 %v2174_v54  ;;  %1236 = vmatpush.bf16.msra.mxu1 %v2202_v61 }
 0x31a   :  { %1249 = vmatpush.bf16.msra.mxu2 %v2340_v51  ;;  %1262 = vmatpush.bf16.msra.mxu3 %v2213_v1 }
 0x31d   :  { %1224 = vmatpush.bf16.msra.mxu0 %v2197_v59  ;;  %1237 = vmatpush.bf16.msra.mxu1 %v2223_v4 }
 0x31e   :  { %1250 = vmatpush.bf16.msra.mxu2 %v2352_v56  ;;  %1263 = vmatpush.bf16.msra.mxu3 %v2236_v10 }
 0x321   :  { %1225 = vmatpush.bf16.msra.mxu0 %v2234_v9  ;;  %1238 = vmatpush.bf16.msra.mxu1 %v2286_v27 }
 0x322   :  { %1251 = vmatpush.bf16.msra.mxu2 %v2370_v5  ;;  %1264 = vmatpush.bf16.msra.mxu3 %v2298_v33 }
 0x325   :  { %1226 = vmatpush.bf16.msra.mxu0 %v2254_v15  ;;  %1239 = vmatpush.bf16.msra.mxu1 %v2313_v40 }
 0x326   :  { %1252 = vmatpush.bf16.msra.mxu2 %v2382_v63  ;;  %1265 = vmatpush.bf16.msra.mxu3 %v2322_v45 }
 0x384   :  { %v978_v38 = vpop.f32.mrf.mxu0  ;;  %v991_v42 = vpop.f32.mrf.mxu1 }
 0x385   :  { %v1021_v31 = vadd.f32 %v978_v38, %v125_v3  ;;  %v1022_v7 = vadd.f32 %v991_v42, %v2854_v21 }
 0x387   :  { %v1749_v36 = vmul.f32 -1.442695, %v1021_v31  ;;  %v1750_v47 = vmul.f32 -1.442695, %v1022_v7 }
 0x389   :  { %1909 = vpow2.f32 %v1749_v36 }
 0x38a   :  { %1911 = vpow2.f32 %v1750_v47 }
 0x38b   :  { %v1004_v50 = vpop.f32.mrf.mxu2  ;;  %v1017_v57 = vpop.f32.mrf.mxu3 }
 0x38c   :  { %v1024_v6 = vadd.f32 %v1017_v57, %v2855_v19  ;;  %v980_v62 = vpop.f32.mrf.mxu0  ;;  %v993_v17 = vpop.f32.mrf.mxu1  ;;  %v1023_v11 = vadd.f32 %v1004_v50, %v2856_v37 }
 0x38e   :  { %v1751_v13 = vmul.f32 -1.442695, %v1024_v6 }
 0x38f   :  { %v1910_v30 = vpop.eup %1909 }
 0x390   :  { %v1912_v8 = vpop.eup %1911  ;;  %v1028_v58 = vadd.f32 1.0, %v1910_v30  ;;  %1913 = vpow2.f32 %v1751_v13 }
 0x391   :  { %v1047_v44 = vadd.f32 1.0, %v1912_v8 }
 0x392   :  { %1915 = vrcp.f32 %v1028_v58  ;;  %v1040_v7 = vand.u32 2147483648, %v1028_v58  ;;  %v1038_v57 = vand.u32 2147483647, %v1028_v58  ;;  %vm1034_vm3 = vweird.f32 %v1028_v58 }
 0x393   :  { %1917 = vrcp.f32 %v1047_v44  ;;  %v1006_v14 = vpop.f32.mrf.mxu2  ;;  %v1019_v12 = vpop.f32.mrf.mxu3  ;;  %v1059_v36 = vand.u32 2147483648, %v1047_v44  ;;  %v1057_v6 = vand.u32 2147483647, %v1047_v44  ;;  %vm1053_vm4 = vweird.f32 %v1047_v44 }
 0x394   :  { %v1041_v50 = vor.u32 1.1754944e-38, %v1040_v7  ;;  %vm1039_vm7 = vcmp.eq.f32.partialorder %v1038_v57, 8.507059e+37 }
 0x395   :  { %v1060_v8 = vor.u32 1.1754944e-38, %v1059_v36  ;;  %vm1058_vm8 = vcmp.eq.f32.partialorder %v1057_v6, 8.507059e+37 }
 0x396   :  { %v1914_v25 = vpop.eup %1913 }
 0x397   :  { %v1067_v24 = vadd.f32 1.0, %v1914_v25 }
 0x398   :  { %v1916_v2 = vpop.eup %1915 }
 0x399   :  { %v1918_v3 = vpop.eup %1917  ;;  %v1030_v38 = vmul.f32 %v1916_v2, %v1028_v58  ;;  %1919 = vrcp.f32 %v1067_v24  ;;  %vm1035_vm1 = vweird.f32 %v1916_v2  ;;  %v1079_v7 = vand.u32 2147483648, %v1067_v24 }
 0x39a   :  { %v1049_v42 = vmul.f32 %v1918_v3, %v1047_v44  ;;  %1921 = vtanh.f32 %v1023_v11  ;;  %vm1054_vm2 = vweird.f32 %v1918_v3  ;;  %vm1036_vm5 = vmor %vm1034_vm3, %vm1035_vm1  ;;  %vm1073_vm10 = vweird.f32 %v1067_v24 }
 0x39b   :  { %v1031_v31 = vsub.f32 1.0, %v1030_v38  ;;  %vm1055_vm6 = vmor %vm1053_vm4, %vm1054_vm2 }
 0x39c   :  { %v1050_v21 = vsub.f32 1.0, %v1049_v42 }
 0x39d   :  { %v1032_v47 = vmul.f32 %v1916_v2, %v1031_v31 }
 0x39e   :  { %v1051_v19 = vmul.f32 %v1918_v3, %v1050_v21 }
 0x39f   :  { %v1920_v62 = vpop.eup %1919  ;;  %v1033_v17 = vadd.f32 %v1916_v2, %v1032_v47  ;;  %v1080_v47 = vor.u32 1.1754944e-38, %v1079_v7 }
 0x3a0   :  { %v1052_v13 = vadd.f32 %v1918_v3, %v1051_v19  ;;  %v1069_v30 = vmul.f32 %v1920_v62, %v1067_v24  ;;  %v1922_v12 = vpop.eup %1921  ;;  %vm1074_vm9 = vweird.f32 %v1920_v62 }
 0x3a1   :  { %v1037_v14 = vsel %vm1036_vm5, %v1916_v2, %v1033_v17  ;;  %v1077_v2 = vand.u32 2147483647, %v1067_v24  ;;  %vm1075_vm11 = vmor %vm1073_vm10, %vm1074_vm9 }
 0x3a2   :  { %v1042_v25 = vsel %vm1039_vm7, %v1041_v50, %v1037_v14  ;;  %v1056_v37 = vsel %vm1055_vm6, %v1918_v3, %v1052_v13  ;;  %v1070_v11 = vsub.f32 1.0, %v1069_v30 }
 0x3a3   :  { %v1061_v38 = vsel %vm1058_vm8, %v1060_v8, %v1056_v37  ;;  %v1084_v42 = vmul.f32 %v1922_v12, %v1042_v25  ;;  %vm1078_vm12 = vcmp.eq.f32.partialorder %v1077_v2, 8.507059e+37 }
 0x3a4   :  { %v1083_v31 = vmul.f32 %v1061_v38, %v2638_v23  ;;  %v1071_v21 = vmul.f32 %v1920_v62, %v1070_v11 }
 0x3a6   :  { %v2683_v58 = vadd.f32 %v1084_v42, %v1083_v31  ;;  %v1072_v44 = vadd.f32 %v1920_v62, %v1071_v21 }
 0x3a8   :  { %1923 = vtanh.f32 %v2683_v58  ;;  %v1076_v36 = vsel %vm1075_vm11, %v1920_v62, %v1072_v44 }
 0x3a9   :  { %v1081_v57 = vsel %vm1078_vm12, %v1080_v47, %v1076_v36 }
 0x3ae   :  { %v1924_v3 = vpop.eup %1923 }
 0x3af   :  { %v2686_v19 = vmul.f32 %v1924_v3, %v1081_v57 }
 0x3b1   :  { %v1093_v23 = vpack.c.bf16 %v2686_v19, %v2686_v19 }
 0x3b3   :  { %1102 = vmatmul.bf16.vlgmr.msrb.gmra.mxu0 %v1093_v23  ;;  %1115 = vmatmul.bf16.vlgmr.msrb.gmra.mxu1 %v1093_v23 }
 0x3b4   :  { %1128 = vmatmul.bf16.vlgmr.msrb.gmra.mxu2 %v1093_v23  ;;  %1141 = vmatmul.bf16.vlgmr.msrb.gmra.mxu3 %v1093_v23 }
 0x3b5   :  { %1344 = vmatpush.bf16.msrb.mxu0 %v2057_v18  ;;  %1357 = vmatpush.bf16.msrb.mxu1 %v2072_v22  ;;  %v2857_v18 = vld [vmem:[#allocation7_spill] sm:$0xff] }
 0x3b6   :  { %1370 = vmatpush.bf16.msrb.mxu2 %v2256_v16  ;;  %1383 = vmatpush.bf16.msrb.mxu3 %v2085_v26  ;;  %v127_v22 = vadd.f32 %v2857_v18, %v2488_v53 }
 0x3b9   :  { %1345 = vmatpush.bf16.msrb.mxu0 %v2092_v28  ;;  %1358 = vmatpush.bf16.msrb.mxu1 %v2094_v29 }
 0x3ba   :  { %1371 = vmatpush.bf16.msrb.mxu2 %v2267_v20  ;;  %1384 = vmatpush.bf16.msrb.mxu3 %v2109_v34  ;;  %v2858_v34 = vld [vmem:[#allocation18_spill] sm:$0xff] }
 0x3bd   :  { %1346 = vmatpush.bf16.msrb.mxu0 %v2128_v39  ;;  %1359 = vmatpush.bf16.msrb.mxu1 %v2133_v41 }
 0x3be   :  { %1372 = vmatpush.bf16.msrb.mxu2 %v2296_v32  ;;  %1385 = vmatpush.bf16.msrb.mxu3 %v2139_v43 }
 0x3c1   :  { %1347 = vmatpush.bf16.msrb.mxu0 %v2155_v48  ;;  %1360 = vmatpush.bf16.msrb.mxu1 %v2158_v49 }
 0x3c2   :  { %1373 = vmatpush.bf16.msrb.mxu2 %v2326_v46  ;;  %1386 = vmatpush.bf16.msrb.mxu3 %v2167_v52  ;;  %v2859_v52 = vld [vmem:[#allocation19_spill] sm:$0xff] }
 0x3c5   :  { %1348 = vmatpush.bf16.msrb.mxu0 %v2174_v54  ;;  %1361 = vmatpush.bf16.msrb.mxu1 %v2202_v61 }
 0x3c6   :  { %1374 = vmatpush.bf16.msrb.mxu2 %v2340_v51  ;;  %1387 = vmatpush.bf16.msrb.mxu3 %v2213_v1 }
 0x3c9   :  { %1349 = vmatpush.bf16.msrb.mxu0 %v2197_v59  ;;  %1362 = vmatpush.bf16.msrb.mxu1 %v2223_v4 }
 0x3ca   :  { %1375 = vmatpush.bf16.msrb.mxu2 %v2352_v56  ;;  %1388 = vmatpush.bf16.msrb.mxu3 %v2236_v10 }
 0x3cd   :  { %1350 = vmatpush.bf16.msrb.mxu0 %v2234_v9  ;;  %1363 = vmatpush.bf16.msrb.mxu1 %v2286_v27 }
 0x3ce   :  { %1376 = vmatpush.bf16.msrb.mxu2 %v2370_v5  ;;  %1389 = vmatpush.bf16.msrb.mxu3 %v2298_v33 }
 0x3d1   :  { %1351 = vmatpush.bf16.msrb.mxu0 %v2254_v15  ;;  %1364 = vmatpush.bf16.msrb.mxu1 %v2313_v40  ;;  %v2860_v40 = vld [vmem:[#allocation14_spill] sm:$0xff] }
 0x3d2   :  { %1377 = vmatpush.bf16.msrb.mxu2 %v2382_v63  ;;  %1390 = vmatpush.bf16.msrb.mxu3 %v2322_v45 }
 0x430   :  { %v1103_v26 = vpop.f32.mrf.mxu0  ;;  %v1116_v28 = vpop.f32.mrf.mxu1 }
 0x431   :  { %v1146_v29 = vadd.f32 %v1103_v26, %v127_v22  ;;  %v1147_v39 = vadd.f32 %v1116_v28, %v2858_v34  ;;  %v1840_v34 = vld [vmem:[%s2826_s4 + $0x38] sm:$0xff] }
 0x433   :  { %v1752_v41 = vmul.f32 -1.442695, %v1146_v29  ;;  %v1753_v43 = vmul.f32 -1.442695, %v1147_v39  ;;  %v2861_v39 = vld [vmem:[#allocation6_spill] sm:$0xff] }
 0x435   :  { %1925 = vpow2.f32 %v1752_v41  ;;  %v130_v41 = vadd.f32 %v2861_v39, %v2488_v53 }
 0x436   :  { %1927 = vpow2.f32 %v1753_v43 }
 0x437   :  { %v1129_v48 = vpop.f32.mrf.mxu2  ;;  %v1142_v49 = vpop.f32.mrf.mxu3 }
 0x438   :  { %v1149_v54 = vadd.f32 %v1142_v49, %v2859_v52  ;;  %v1105_v59 = vpop.f32.mrf.mxu0  ;;  %v1118_v61 = vpop.f32.mrf.mxu1  ;;  %v1148_v45 = vadd.f32 %v1129_v48, %v2860_v40  ;;  %v2862_v52 = vld [vmem:[#allocation21_spill] sm:$0xff] }
 0x439   :  { %v1839_v59 = vld [vmem:[%s2826_s4 + $0x30] sm:$0xff] }
 0x43a   :  { %v1754_v1 = vmul.f32 -1.442695, %v1149_v54 }
 0x43b   :  { %v1926_v4 = vpop.eup %1925 }
 0x43c   :  { %v1928_v9 = vpop.eup %1927  ;;  %v1153_v10 = vadd.f32 1.0, %v1926_v4  ;;  %1929 = vpow2.f32 %v1754_v1  ;;  %v1838_v4 = vld [vmem:[%s2826_s4 + $0x28] sm:$0xff] }
 0x43d   :  { %v1172_v15 = vadd.f32 1.0, %v1928_v9 }
 0x43e   :  { %1931 = vrcp.f32 %v1153_v10  ;;  %v1165_v24 = vand.u32 2147483648, %v1153_v10  ;;  %v1163_v17 = vand.u32 2147483647, %v1153_v10  ;;  %vm1159_vm15 = vweird.f32 %v1153_v10 }
 0x43f   :  { %1933 = vrcp.f32 %v1172_v15  ;;  %v1131_v16 = vpop.f32.mrf.mxu2  ;;  %v1144_v20 = vpop.f32.mrf.mxu3  ;;  %v1184_v6 = vand.u32 2147483648, %v1172_v15  ;;  %v1182_v13 = vand.u32 2147483647, %v1172_v15  ;;  %vm1178_vm0 = vweird.f32 %v1172_v15 }
 0x440   :  { %v1166_v14 = vor.u32 1.1754944e-38, %v1165_v24  ;;  %vm1164_vm3 = vcmp.eq.f32.partialorder %v1163_v17, 8.507059e+37  ;;  %v1835_v24 = vld [vmem:[%s2826_s4 + $0x10] sm:$0xff] }
 0x441   :  { %v1185_v37 = vor.u32 1.1754944e-38, %v1184_v6  ;;  %vm1183_vm4 = vcmp.eq.f32.partialorder %v1182_v13, 8.507059e+37 }
 0x442   :  { %v1930_v27 = vpop.eup %1929 }
 0x443   :  { %v1192_v32 = vadd.f32 1.0, %v1930_v27 }
 0x444   :  { %v1932_v33 = vpop.eup %1931 }
 0x445   :  { %v1934_v46 = vpop.eup %1933  ;;  %v1155_v51 = vmul.f32 %v1932_v33, %v1153_v10  ;;  %1935 = vrcp.f32 %v1192_v32  ;;  %vm1160_vm13 = vweird.f32 %v1932_v33  ;;  %v1204_v57 = vand.u32 2147483648, %v1192_v32 }
 0x446   :  { %v1174_v56 = vmul.f32 %v1934_v46, %v1172_v15  ;;  %1937 = vtanh.f32 %v1148_v45  ;;  %vm1179_vm14 = vweird.f32 %v1934_v46  ;;  %vm1161_vm1 = vmor %vm1159_vm15, %vm1160_vm13  ;;  %vm1198_vm6 = vweird.f32 %v1192_v32  ;;  %v2863_v15 = vld [vmem:[#allocation22_spill] sm:$0xff] }
 0x447   :  { %v1156_v5 = vsub.f32 1.0, %v1155_v51  ;;  %vm1180_vm2 = vmor %vm1178_vm0, %vm1179_vm14  ;;  %v1202_v23 = vand.u32 2147483647, %v1192_v32  ;;  %v1205_v22 = vor.u32 1.1754944e-38, %v1204_v57 }
 0x448   :  { %v1175_v63 = vsub.f32 1.0, %v1174_v56 }
 0x449   :  { %v1157_v62 = vmul.f32 %v1932_v33, %v1156_v5  ;;  %vm1203_vm8 = vcmp.eq.f32.partialorder %v1202_v23, 8.507059e+37 }
 0x44a   :  { %v1176_v50 = vmul.f32 %v1934_v46, %v1175_v63  ;;  %v1836_v63 = vld [vmem:[%s2826_s4 + $0x18] sm:$0xff] }
 0x44b   :  { %v1936_v30 = vpop.eup %1935  ;;  %v1158_v8 = vadd.f32 %v1932_v33, %v1157_v62 }
 0x44c   :  { %v1177_v12 = vadd.f32 %v1934_v46, %v1176_v50  ;;  %v1194_v25 = vmul.f32 %v1936_v30, %v1192_v32  ;;  %v1938_v38 = vpop.eup %1937  ;;  %vm1199_vm5 = vweird.f32 %v1936_v30  ;;  %v1837_v32 = vld [vmem:[%s2826_s4 + $0x20] sm:$0xff] }
 0x44d   :  { %v1162_v11 = vsel %vm1161_vm1, %v1932_v33, %v1158_v8  ;;  %vm1200_vm7 = vmor %vm1198_vm6, %vm1199_vm5  ;;  %v2864_v50 = vld [vmem:[#allocation17_spill] sm:$0xff] }
 0x44e   :  { %v1167_v42 = vsel %vm1164_vm3, %v1166_v14, %v1162_v11  ;;  %v1181_v31 = vsel %vm1180_vm2, %v1934_v46, %v1177_v12  ;;  %v1195_v21 = vsub.f32 1.0, %v1194_v25  ;;  %v1834_v14 = vld [vmem:[%s2826_s4 + $0x8] sm:$0xff] }
 0x44f   :  { %v1186_v44 = vsel %vm1183_vm4, %v1185_v37, %v1181_v31  ;;  %v1209_v7 = vmul.f32 %v1938_v38, %v1167_v42 }
 0x450   :  { %v1208_v2 = vmul.f32 %v1186_v44, %v2683_v58  ;;  %v1196_v36 = vmul.f32 %v1936_v30, %v1195_v21  ;;  %v1833_v21 = vld [vmem:[%s2826_s4] sm:$0xff] }
 0x452   :  { %v2728_v47 = vadd.f32 %v1209_v7, %v1208_v2  ;;  %v1197_v3 = vadd.f32 %v1936_v30, %v1196_v36 }
 0x454   :  { %1939 = vtanh.f32 %v2728_v47  ;;  %v1201_v18 = vsel %vm1200_vm7, %v1936_v30, %v1197_v3 }
 0x455   :  { %v1206_v28 = vsel %vm1203_vm8, %v1205_v22, %v1201_v18 }
 0x45a   :  { %v1940_v26 = vpop.eup %1939 }
 0x45b   :  { %v2731_v29 = vmul.f32 %v1940_v26, %v1206_v28 }
 0x45d   :  { %v1218_v58 = vpack.c.bf16 %v2731_v29, %v2731_v29 }
 0x45f   :  { %1227 = vmatmul.bf16.vlgmr.msra.gmra.mxu0 %v1218_v58  ;;  %1240 = vmatmul.bf16.vlgmr.msra.gmra.mxu1 %v1218_v58 }
 0x460   :  { %1253 = vmatmul.bf16.vlgmr.msra.gmra.mxu2 %v1218_v58  ;;  %1266 = vmatmul.bf16.vlgmr.msra.gmra.mxu3 %v1218_v58 }
 0x461   :  { %1518 = vmatpush.bf16.msra.mxu0 %v1840_v34 }
 0x465   :  { %1519 = vmatpush.bf16.msra.mxu0 %v1839_v59 }
 0x469   :  { %1520 = vmatpush.bf16.msra.mxu0 %v1838_v4 }
 0x46d   :  { %1521 = vmatpush.bf16.msra.mxu0 %v1837_v32 }
 0x471   :  { %1522 = vmatpush.bf16.msra.mxu0 %v1836_v63 }
 0x475   :  { %1523 = vmatpush.bf16.msra.mxu0 %v1835_v24 }
 0x479   :  { %1524 = vmatpush.bf16.msra.mxu0 %v1834_v14 }
 0x47d   :  { %1525 = vmatpush.bf16.msra.mxu0 %v1833_v21 }
 0x4dc   :  { %v1228_v43 = vpop.f32.mrf.mxu0  ;;  %v1241_v48 = vpop.f32.mrf.mxu1 }
 0x4dd   :  { %v1271_v49 = vadd.f32 %v1228_v43, %v130_v41  ;;  %v1272_v54 = vadd.f32 %v1241_v48, %v2862_v52 }
 0x4df   :  { %v1755_v61 = vmul.f32 -1.442695, %v1271_v49  ;;  %v1756_v1 = vmul.f32 -1.442695, %v1272_v54 }
 0x4e1   :  { %1941 = vpow2.f32 %v1755_v61 }
 0x4e2   :  { %1943 = vpow2.f32 %v1756_v1 }
 0x4e3   :  { %v1254_v9 = vpop.f32.mrf.mxu2  ;;  %v1267_v10 = vpop.f32.mrf.mxu3 }
 0x4e4   :  { %v1274_v16 = vadd.f32 %v1267_v10, %v2863_v15  ;;  %v1230_v20 = vpop.f32.mrf.mxu0  ;;  %v1243_v27 = vpop.f32.mrf.mxu1  ;;  %v1273_v13 = vadd.f32 %v1254_v9, %v2864_v50  ;;  %v1463_v15 = vpack.c.bf16 %v2551_v55, %v2502_v0 }
 0x4e5   :  { %v1465_v20 = vpack.c.bf16 %v2731_v29, %v2686_v19  ;;  %v2865_v27 = vld [vmem:[#allocation8_spill] sm:$0xff] }
 0x4e6   :  { %v1757_v33 = vmul.f32 -1.442695, %v1274_v16  ;;  %v1464_v16 = vpack.c.bf16 %v2641_v60, %v2596_v35  ;;  %v132_v32 = vadd.f32 %v2865_v27, %v2488_v53  ;;  %v2867_v35 = vld [vmem:[#allocation24_spill] sm:$0xff] }
 0x4e7   :  { %v1942_v40 = vpop.eup %1941 }
 0x4e8   :  { %v1944_v45 = vpop.eup %1943  ;;  %v1278_v46 = vadd.f32 1.0, %v1942_v40  ;;  %1945 = vpow2.f32 %v1757_v33 }
 0x4e9   :  { %v1297_v51 = vadd.f32 1.0, %v1944_v45 }
 0x4ea   :  { %1947 = vrcp.f32 %v1278_v46  ;;  %v1290_v11 = vand.u32 2147483648, %v1278_v46  ;;  %v1288_v31 = vand.u32 2147483647, %v1278_v46  ;;  %vm1284_vm11 = vweird.f32 %v1278_v46 }
 0x4eb   :  { %1949 = vrcp.f32 %v1297_v51  ;;  %v1256_v56 = vpop.f32.mrf.mxu2  ;;  %v1269_v5 = vpop.f32.mrf.mxu3  ;;  %v1309_v38 = vand.u32 2147483648, %v1297_v51  ;;  %v1307_v7 = vand.u32 2147483647, %v1297_v51  ;;  %vm1303_vm12 = vweird.f32 %v1297_v51 }
 0x4ec   :  { %v1291_v3 = vor.u32 1.1754944e-38, %v1290_v11  ;;  %vm1289_vm15 = vcmp.eq.f32.partialorder %v1288_v31, 8.507059e+37 }
 0x4ed   :  { %v1310_v18 = vor.u32 1.1754944e-38, %v1309_v38  ;;  %vm1308_vm0 = vcmp.eq.f32.partialorder %v1307_v7, 8.507059e+37 }
 0x4ee   :  { %v1946_v6 = vpop.eup %1945 }
 0x4ef   :  { %v1317_v62 = vadd.f32 1.0, %v1946_v6 }
 0x4f0   :  { %v1948_v17 = vpop.eup %1947 }
 0x4f1   :  { %v1950_v30 = vpop.eup %1949  ;;  %v1280_v8 = vmul.f32 %v1948_v17, %v1278_v46  ;;  %1951 = vrcp.f32 %v1317_v62  ;;  %vm1285_vm9 = vweird.f32 %v1948_v17  ;;  %v1329_v54 = vand.u32 2147483648, %v1317_v62  ;;  %v2866_v46 = vld [vmem:[#allocation23_spill] sm:$0xff] }
 0x4f2   :  { %v1299_v12 = vmul.f32 %v1950_v30, %v1297_v51  ;;  %1953 = vtanh.f32 %v1273_v13  ;;  %vm1304_vm10 = vweird.f32 %v1950_v30  ;;  %vm1286_vm13 = vmor %vm1284_vm11, %vm1285_vm9  ;;  %vm1323_vm2 = vweird.f32 %v1317_v62 }
 0x4f3   :  { %v1281_v25 = vsub.f32 1.0, %v1280_v8  ;;  %vm1305_vm14 = vmor %vm1303_vm12, %vm1304_vm10  ;;  %v1327_v59 = vand.u32 2147483647, %v1317_v62  ;;  %v1330_v1 = vor.u32 1.1754944e-38, %v1329_v54 }
 0x4f4   :  { %v1300_v37 = vsub.f32 1.0, %v1299_v12 }
 0x4f5   :  { %v1282_v42 = vmul.f32 %v1948_v17, %v1281_v25  ;;  %vm1328_vm4 = vcmp.eq.f32.partialorder %v1327_v59, 8.507059e+37 }
 0x4f6   :  { %v1301_v44 = vmul.f32 %v1950_v30, %v1300_v37  ;;  %v2868_v37 = vld [vmem:[#allocation20_spill] sm:$0xff] }
 0x4f7   :  { %v1952_v2 = vpop.eup %1951  ;;  %v1283_v36 = vadd.f32 %v1948_v17, %v1282_v42 }
 0x4f8   :  { %v1302_v57 = vadd.f32 %v1950_v30, %v1301_v44  ;;  %v1319_v23 = vmul.f32 %v1952_v2, %v1317_v62  ;;  %v1954_v26 = vpop.eup %1953  ;;  %vm1324_vm1 = vweird.f32 %v1952_v2 }
 0x4f9   :  { %v1287_v22 = vsel %vm1286_vm13, %v1948_v17, %v1283_v36  ;;  %vm1325_vm3 = vmor %vm1323_vm2, %vm1324_vm1  ;;  %v2785_v17 = vld [vmem:[%s2827_s5] ss:$0 sm:$0xff] }
 0x4fa   :  { %v1292_v28 = vsel %vm1289_vm15, %v1291_v3, %v1287_v22  ;;  %v1306_v58 = vsel %vm1305_vm14, %v1950_v30, %v1302_v57  ;;  %v1320_v34 = vsub.f32 1.0, %v1319_v23 }
 0x4fb   :  { %v1311_v39 = vsel %vm1308_vm0, %v1310_v18, %v1306_v58  ;;  %v1334_v41 = vmul.f32 %v1954_v26, %v1292_v28 }
 0x4fc   :  { %v1333_v43 = vmul.f32 %v1311_v39, %v2728_v47  ;;  %v1321_v48 = vmul.f32 %v1952_v2, %v1320_v34 }
 0x4fe   :  { %v2765_v49 = vadd.f32 %v1334_v41, %v1333_v43  ;;  %v1322_v52 = vadd.f32 %v1952_v2, %v1321_v48 }
 0x500   :  { %1955 = vtanh.f32 %v2765_v49  ;;  %v1326_v61 = vsel %vm1325_vm3, %v1952_v2, %v1322_v52 }
 0x501   :  { %v1331_v9 = vsel %vm1328_vm4, %v1330_v1, %v1326_v61 }
 0x506   :  { %v1956_v4 = vpop.eup %1955 }
 0x507   :  { %v2768_v10 = vmul.f32 %v1956_v4, %v1331_v9 }
 0x509   :  { %v1343_v47 = vpack.c.bf16 %v2768_v10, %v2768_v10 }
 0x50b   :  { %1352 = vmatmul.bf16.vlgmr.msrb.gmra.mxu0 %v1343_v47  ;;  %1365 = vmatmul.bf16.vlgmr.msrb.gmra.mxu1 %v1343_v47 }
 0x50c   :  { %1378 = vmatmul.bf16.vlgmr.msrb.gmra.mxu2 %v1343_v47  ;;  %1391 = vmatmul.bf16.vlgmr.msrb.gmra.mxu3 %v1343_v47 }
 0x51b   :  { %1526 = vmatmul.bf16.vlgmr.msra.gmra.mxu0 %v1463_v15 }
 0x52b   :  { %1531 = vmatmul.bf16.gmra.mxu0 %v1464_v16 }
 0x53b   :  { %1536 = vmatmul.bf16.gmra.mxu0 %v1465_v20 }
 0x588   :  { %v1353_v33 = vpop.f32.mrf.mxu0  ;;  %v1366_v40 = vpop.f32.mrf.mxu1 }
 0x589   :  { %v1396_v45 = vadd.f32 %v1353_v33, %v132_v32  ;;  %v1397_v51 = vadd.f32 %v1366_v40, %v2866_v46 }
 0x58b   :  { %v1758_v56 = vmul.f32 -1.442695, %v1396_v45  ;;  %v1759_v5 = vmul.f32 -1.442695, %v1397_v51 }
 0x58d   :  { %1957 = vpow2.f32 %v1758_v56 }
 0x58e   :  { %1959 = vpow2.f32 %v1759_v5 }
 0x58f   :  { %v1379_v0 = vpop.f32.mrf.mxu2  ;;  %v1392_v55 = vpop.f32.mrf.mxu3 }
 0x590   :  { %v1399_v60 = vadd.f32 %v1392_v55, %v2867_v35  ;;  %v1355_v63 = vpop.f32.mrf.mxu0  ;;  %v1368_v24 = vpop.f32.mrf.mxu1  ;;  %v1398_v11 = vadd.f32 %v1379_v0, %v2868_v37 }
 0x592   :  { %v1760_v19 = vmul.f32 -1.442695, %v1399_v60 }
 0x593   :  { %v1958_v29 = vpop.eup %1957 }
 0x594   :  { %v1960_v6 = vpop.eup %1959  ;;  %v1403_v62 = vadd.f32 1.0, %v1958_v29  ;;  %1961 = vpow2.f32 %v1760_v19 }
 0x595   :  { %v1422_v53 = vadd.f32 1.0, %v1960_v6 }
 0x596   :  { %1963 = vrcp.f32 %v1403_v62  ;;  %v1413_v7 = vand.u32 2147483647, %v1403_v62  ;;  %v1415_v2 = vand.u32 2147483648, %v1403_v62  ;;  %vm1409_vm7 = vweird.f32 %v1403_v62 }
 0x597   :  { %1965 = vrcp.f32 %v1422_v53  ;;  %v1381_v50 = vpop.f32.mrf.mxu2  ;;  %v1394_v13 = vpop.f32.mrf.mxu3  ;;  %v1434_v3 = vand.u32 2147483648, %v1422_v53  ;;  %v1432_v22 = vand.u32 2147483647, %v1422_v53  ;;  %vm1428_vm8 = vweird.f32 %v1422_v53 }
 0x598   :  { %v1527_v30 = vpop.f32.mrf.mxu0  ;;  %v1416_v58 = vor.u32 1.1754944e-38, %v1415_v2  ;;  %vm1414_vm11 = vcmp.eq.f32.partialorder %v1413_v7, 8.507059e+37 }
 0x599   :  { %v1528_v8 = vadd.f32 %v2785_v17, %v1527_v30  ;;  %v1435_v41 = vor.u32 1.1754944e-38, %v1434_v3  ;;  %vm1433_vm12 = vcmp.eq.f32.partialorder %v1432_v22, 8.507059e+37 }
 0x59a   :  { %v1962_v14 = vpop.eup %1961 }
 0x59b   :  { %v1442_v12 = vadd.f32 1.0, %v1962_v14  ;;  %1547 = vst [vmem:[%s2828_s6] sm:$0xff] %v1528_v8 }
 0x59c   :  { %v1964_v25 = vpop.eup %1963 }
 0x59d   :  { %v1966_v38 = vpop.eup %1965  ;;  %v1405_v42 = vmul.f32 %v1964_v25, %v1403_v62  ;;  %1967 = vrcp.f32 %v1442_v12  ;;  %vm1410_vm5 = vweird.f32 %v1964_v25  ;;  %v1454_v27 = vand.u32 2147483648, %v1442_v12 }
 0x59e   :  { %v1424_v31 = vmul.f32 %v1966_v38, %v1422_v53  ;;  %1969 = vtanh.f32 %v1398_v11  ;;  %vm1429_vm6 = vweird.f32 %v1966_v38  ;;  %vm1411_vm9 = vmor %vm1409_vm7, %vm1410_vm5  ;;  %vm1448_vm14 = vweird.f32 %v1442_v12 }
 0x59f   :  { %v1406_v21 = vsub.f32 1.0, %v1405_v42  ;;  %vm1430_vm10 = vmor %vm1428_vm8, %vm1429_vm6  ;;  %v1452_v32 = vand.u32 2147483647, %v1442_v12  ;;  %v1455_v45 = vor.u32 1.1754944e-38, %v1454_v27 }
 0x5a0   :  { %v1425_v44 = vsub.f32 1.0, %v1424_v31  ;;  %v1529_v36 = vpop.f32.mrf.mxu0 }
 0x5a1   :  { %v1407_v57 = vmul.f32 %v1964_v25, %v1406_v21  ;;  %v1530_v23 = vadd.f32 %v2785_v17, %v1529_v36  ;;  %vm1453_vm0 = vcmp.eq.f32.partialorder %v1452_v32, 8.507059e+37 }
 0x5a2   :  { %v1426_v18 = vmul.f32 %v1966_v38, %v1425_v44 }
 0x5a3   :  { %v1968_v26 = vpop.eup %1967  ;;  %v1408_v28 = vadd.f32 %v1964_v25, %v1407_v57  ;;  %1548 = vst [vmem:[%s2828_s6 + $0x8] sm:$0xff] %v1530_v23 }
 0x5a4   :  { %v1427_v34 = vadd.f32 %v1966_v38, %v1426_v18  ;;  %v1444_v39 = vmul.f32 %v1968_v26, %v1442_v12  ;;  %v1970_v48 = vpop.eup %1969  ;;  %vm1449_vm13 = vweird.f32 %v1968_v26 }
 0x5a5   :  { %v1412_v43 = vsel %vm1411_vm9, %v1964_v25, %v1408_v28  ;;  %vm1450_vm15 = vmor %vm1448_vm14, %vm1449_vm13 }
 0x5a6   :  { %v1417_v52 = vsel %vm1414_vm11, %v1416_v58, %v1412_v43  ;;  %v1431_v54 = vsel %vm1430_vm10, %v1966_v38, %v1427_v34  ;;  %v1445_v59 = vsub.f32 1.0, %v1444_v39 }
 0x5a7   :  { %v1436_v61 = vsel %vm1433_vm12, %v1435_v41, %v1431_v54  ;;  %v1459_v1 = vmul.f32 %v1970_v48, %v1417_v52 }
 0x5a8   :  { %v1458_v4 = vmul.f32 %v1436_v61, %v2765_v49  ;;  %v1532_v9 = vpop.f32.mrf.mxu0  ;;  %v1446_v47 = vmul.f32 %v1968_v26, %v1445_v59 }
 0x5a9   :  { %v1533_v15 = vadd.f32 %v2785_v17, %v1532_v9 }
 0x5aa   :  { %v1460_v16 = vadd.f32 %v1459_v1, %v1458_v4  ;;  %v1447_v20 = vadd.f32 %v1968_v26, %v1446_v47 }
 0x5ab   :  { %1549 = vst [vmem:[%s2828_s6 + $0x10] sm:$0xff] %v1533_v15 }
 0x5ac   :  { %1971 = vtanh.f32 %v1460_v16  ;;  %v1451_v33 = vsel %vm1450_vm15, %v1968_v26, %v1447_v20 }
 0x5ad   :  { %v1456_v51 = vsel %vm1453_vm0, %v1455_v45, %v1451_v33 }
 0x5b0   :  { %v1534_v40 = vpop.f32.mrf.mxu0 }
 0x5b1   :  { %v1535_v49 = vadd.f32 %v2785_v17, %v1534_v40 }
 0x5b2   :  { %v1972_v46 = vpop.eup %1971 }
 0x5b3   :  { %1550 = vst [vmem:[%s2828_s6 + $0x18] sm:$0xff] %v1535_v49  ;;  %v1462_v56 = vmul.f32 %v1972_v46, %v1456_v51 }
 0x5b5   :  { %v1466_v5 = vpack.c.bf16 %v1462_v56, %v2768_v10 }
 0x5b7   :  { %1541 = vmatmul.bf16.gmra.mxu0 %v1466_v5 }
 0x5b8   :  { %v1537_v0 = vpop.f32.mrf.mxu0 }
 0x5b9   :  { %v1538_v55 = vadd.f32 %v2785_v17, %v1537_v0 }
 0x5bb   :  { %1551 = vst [vmem:[%s2828_s6 + $0x20] sm:$0xff] %v1538_v55 }
 0x5c0   :  { %v1539_v35 = vpop.f32.mrf.mxu0 }
 0x5c1   :  { %v1540_v60 = vadd.f32 %v2785_v17, %v1539_v35 }
 0x5c3   :  { %1552 = vst [vmem:[%s2828_s6 + $0x28] sm:$0xff] %v1540_v60 }
 0x634   :  { %v1542_v63 = vpop.f32.mrf.mxu0 }
 0x635   :  { %v1543_v24 = vadd.f32 %v2785_v17, %v1542_v63 }
 0x637   :  { %1553 = vst [vmem:[%s2828_s6 + $0x30] sm:$0xff] %v1543_v24 }
 0x63c   :  { %v1544_v10 = vpop.f32.mrf.mxu0 }
 0x63d   :  { %v1545_v19 = vadd.f32 %v2785_v17, %v1544_v10 }
 0x63f   :  { %1554 = vst [vmem:[%s2828_s6 + $0x38] sm:$0xff] %v1545_v19 }

</bundles_post_ra>
